<compile_context>
chip_gen: v6e
topology: v6e:2x2x1
jax: 0.10.0
libtpu: 0.0.40
codegen_flags: <defaults>
</compile_context>

<pallas_src>
import functools

import jax
import jax.numpy as jnp
from jax.experimental import pallas as pl
from jax.experimental.pallas import tpu as pltpu


def _round_up(x, m):
    return ((x + m - 1) // m) * m


# -----------------------------------------------------------------------------
# Glue: edge Laplacian construction (plain JAX, scatter-based)
# -----------------------------------------------------------------------------
def edge_laplacian(edge_index, undirected_mask, matrix_type, num_nodes):
    """L = B^T B with B the (num_nodes, E) node-edge incidence matrix."""
    E = edge_index.shape[1]
    src = edge_index[0]
    dst = edge_index[1]
    eid = jnp.arange(E)
    if matrix_type == "orientation-equivariant":
        src_val = jnp.where(undirected_mask, 1.0, -1.0).astype(jnp.float32)
    else:  # orientation-invariant
        src_val = jnp.ones((E,), dtype=jnp.float32)
    dst_val = jnp.ones((E,), dtype=jnp.float32)
    B = jnp.zeros((num_nodes, E), dtype=jnp.float32)
    B = B.at[src, eid].add(src_val)
    B = B.at[dst, eid].add(dst_val)
    return B.T @ B


# -----------------------------------------------------------------------------
# Pass 1: degree reduction -> dinv_pos, dinv_neg, plus fused pad+cast of L
# -----------------------------------------------------------------------------
def _degree_cast_kernel(L_ref, umr_ref, umc_ref, dp_ref, dn_ref, Lc_ref,
                        accp_ref, accn_ref):
    k = pl.program_id(1)

    @pl.when(k == 0)
    def _():
        accp_ref[...] = jnp.zeros_like(accp_ref)
        accn_ref[...] = jnp.zeros_like(accn_ref)

    Lt = L_ref[...]                                   # f32 (TM, TK)
    # Fused pad+cast: emit the compute-dtype L tile that pass 2 will consume.
    Lc_ref[...] = Lt.astype(Lc_ref.dtype)

    # |L_pos| / |L_neg| row sums, masked split in f32 (exact degrees).
    umf = jnp.maximum(umr_ref[...], umc_ref[...])     # (TM,1)x(1,TK)->(TM,TK)
    m = jnp.abs(Lt) * umf
    lp_mag = jnp.maximum(Lt, m)                       # |L_pos|
    ln_mag = jnp.maximum(-Lt, m)                      # |L_neg|
    accp_ref[...] += jnp.sum(lp_mag, axis=1, keepdims=True)
    accn_ref[...] += jnp.sum(ln_mag, axis=1, keepdims=True)

    @pl.when(k == pl.num_programs(1) - 1)
    def _():
        degp = accp_ref[...]
        degn = accn_ref[...]
        dp_ref[...] = jnp.where(degp > 0.0, jax.lax.rsqrt(degp), 0.0)
        dn_ref[...] = jnp.where(degn > 0.0, jax.lax.rsqrt(degn), 0.0)


# -----------------------------------------------------------------------------
# Pass 2: main tiled kernel
#   out = dinv_pos * (L_pos @ (dinv_pos * xp)) + dinv_neg * (L_neg @ (dinv_neg * xn))
#         + (xs + bias)
# -----------------------------------------------------------------------------
def _dir_edge_conv_kernel(L_ref, umr_ref, umc_ref, yp_ref, yn_ref,
                          dp_ref, dn_ref, sb_ref, out_ref,
                          accp_ref, accn_ref, *, blk, mask_dtype):
    k = pl.program_id(1)

    @pl.when(k == 0)
    def _():
        accp_ref[...] = jnp.zeros_like(accp_ref)
        accn_ref[...] = jnp.zeros_like(accn_ref)

    # Masked split of the L tile on the fly (stays in vregs, no (E,E) temps).
    # 4 VPU ops / element; done in bf16 when the chip has a bf16 VALU.
    Lt = L_ref[...].astype(mask_dtype)                # no-op when dtypes match
    umf = jnp.maximum(umr_ref[...].astype(mask_dtype),
                      umc_ref[...].astype(mask_dtype))
    m = jnp.abs(Lt) * umf
    Lp = jnp.maximum(Lt, m)
    Ln = jnp.minimum(Lt, -m)

    # Resident features: DMA'd once per pallas_call, sliced per reduction step.
    off = pl.multiple_of(k * blk, blk)
    yp = yp_ref[pl.ds(off, blk), :]
    yn = yn_ref[pl.ds(off, blk), :]
    cdt = yp.dtype                                    # bf16 or f32 MXU feed
    accp_ref[...] += jnp.dot(Lp.astype(cdt), yp,
                             preferred_element_type=jnp.float32)
    accn_ref[...] += jnp.dot(Ln.astype(cdt), yn,
                             preferred_element_type=jnp.float32)

    @pl.when(k == pl.num_programs(1) - 1)
    def _():
        out_ref[...] = (dp_ref[...] * accp_ref[...]
                        + dn_ref[...] * accn_ref[...]
                        + sb_ref[...])


# -----------------------------------------------------------------------------
# Tile / dtype / VMEM selection helpers
# -----------------------------------------------------------------------------
def _pick_block(E, max_block):
    er = _round_up(E, 128)
    blk = min(max_block, er)
    # Keep >= 2 row tiles when possible so the "parallel" axis can be sharded
    # across v7x's two TensorCores (no effect on single-TC v5e/v6e).
    if er // blk < 2 and er >= 256:
        blk = max(128, _round_up(er // 2, 128))
    return blk


def _pick_mask_dtype(compute_dtype):
    """bf16 masked split on chips with a bf16 VALU (v6e/v7x); f32 otherwise."""
    if jnp.dtype(compute_dtype) == jnp.dtype(jnp.float32):
        return jnp.float32
    try:
        kind = jax.devices()[0].device_kind.lower()
    except Exception:
        kind = ""
    for tag in ("v2", "v3", "v4", "v5"):
        if tag in kind:
            return jnp.float32        # no packed bf16 VALU -> keep masking f32
    return jnp.dtype(compute_dtype)


def _vmem_limit_bytes(blk, Ep, Cp, csize, msize):
    lane = 128
    b = 0
    b += 2 * blk * blk * 4                    # pass-1 f32 L tiles (2 buffers)
    b += 2 * blk * blk * csize                # compute-dtype L tiles
    b += 6 * blk * blk * max(msize, 4)        # masked-split temporaries margin
    b += 2 * 2 * Ep * Cp * csize              # resident yp / yn
    b += 6 * blk * Cp * 4                     # sb, out, two f32 accumulators
    b += 8 * blk * lane * 4                   # mask / dinv row vectors (padded)
    b += 8 << 20                              # slack
    # Clamp: >=32 MiB, and <=56 MiB so it stays inside v7x's 64 MiB/TC.
    return int(min(max(b, 32 << 20), 56 << 20))


# -----------------------------------------------------------------------------
# Wrapper
# -----------------------------------------------------------------------------
def dir_edge_conv_pallas(L, undirected_mask, edge_attr, w_pos, w_neg, w_skip,
                         bias, *, compute_dtype=jnp.bfloat16, max_block=1024):
    E, c_in = edge_attr.shape
    c_out = w_pos.shape[1]
    compute_dtype = jnp.dtype(compute_dtype)
    mask_dtype = _pick_mask_dtype(compute_dtype)

    blk = _pick_block(E, max_block)
    Ep = _round_up(E, blk)
    Cp = _round_up(c_out, 128)        # lane-dense output / feature operands

    bias_arr = bias if bias is not None else jnp.zeros((c_out,), jnp.float32)

    # --- padded inputs -------------------------------------------------------
    L_pad = jnp.zeros((Ep, Ep), jnp.float32).at[:E, :E].set(
        L.astype(jnp.float32))
    um_f = undirected_mask.astype(jnp.float32)
    umr = jnp.zeros((Ep, 1), jnp.float32).at[:E, 0].set(um_f)
    umc = jnp.zeros((1, Ep), jnp.float32).at[0, :E].set(um_f)
    x_p = jnp.zeros((Ep, c_in), jnp.float32).at[:E, :].set(
        edge_attr.astype(jnp.float32))

    # Tiny (E,Cin)@(Cin,Cout) projections: hoisted out of the kernel (XLA).
    xp = x_p @ w_pos
    xn = x_p @ w_neg
    xs = x_p @ w_skip

    grid = (Ep // blk, Ep // blk)
    cparams = pltpu.CompilerParams(
        dimension_semantics=("parallel", "arbitrary"),
        vmem_limit_bytes=_vmem_limit_bytes(blk, Ep, Cp, compute_dtype.itemsize,
                                           jnp.dtype(mask_dtype).itemsize))

    # --- pass 1: D^{-1/2} vectors + fused pad/cast of L ----------------------
    dinv_pos, dinv_neg, L_c = pl.pallas_call(
        _degree_cast_kernel,
        out_shape=(jax.ShapeDtypeStruct((Ep, 1), jnp.float32),
                   jax.ShapeDtypeStruct((Ep, 1), jnp.float32),
                   jax.ShapeDtypeStruct((Ep, Ep), compute_dtype)),
        grid=grid,
        in_specs=[pl.BlockSpec((blk, blk), lambda i, k: (i, k)),   # f32 L tile
                  pl.BlockSpec((blk, 1), lambda i, k: (i, 0)),     # row mask
                  pl.BlockSpec((1, blk), lambda i, k: (0, k))],    # col mask
        out_specs=(pl.BlockSpec((blk, 1), lambda i, k: (i, 0)),
                   pl.BlockSpec((blk, 1), lambda i, k: (i, 0)),
                   pl.BlockSpec((blk, blk), lambda i, k: (i, k))),
        scratch_shapes=[pltpu.VMEM((blk, 1), jnp.float32),
                        pltpu.VMEM((blk, 1), jnp.float32)],
        compiler_params=cparams,
    )(L_pad, umr, umc)

    # Fold the column-side normalization into the projected features (cheap,
    # O(E*Cout)); pad the lane dim to Cp for unmasked stores / dense vregs.
    yp = jnp.zeros((Ep, Cp), compute_dtype).at[:, :c_out].set(
        (dinv_pos * xp).astype(compute_dtype))
    yn = jnp.zeros((Ep, Cp), compute_dtype).at[:, :c_out].set(
        (dinv_neg * xn).astype(compute_dtype))
    sb = jnp.zeros((Ep, Cp), jnp.float32).at[:, :c_out].set(xs + bias_arr)

    # --- pass 2: tiled Laplacian matmuls + finalize --------------------------
    kernel = functools.partial(_dir_edge_conv_kernel, blk=blk,
                               mask_dtype=mask_dtype)
    out_p = pl.pallas_call(
        kernel,
        out_shape=jax.ShapeDtypeStruct((Ep, Cp), jnp.float32),
        grid=grid,
        in_specs=[pl.BlockSpec((blk, blk), lambda i, k: (i, k)),   # L tile
                  pl.BlockSpec((blk, 1), lambda i, k: (i, 0)),     # row mask
                  pl.BlockSpec((1, blk), lambda i, k: (0, k)),     # col mask
                  pl.BlockSpec((Ep, Cp), lambda i, k: (0, 0)),     # yp resident
                  pl.BlockSpec((Ep, Cp), lambda i, k: (0, 0)),     # yn resident
                  pl.BlockSpec((blk, 1), lambda i, k: (i, 0)),     # dinv_pos row
                  pl.BlockSpec((blk, 1), lambda i, k: (i, 0)),     # dinv_neg row
                  pl.BlockSpec((blk, Cp), lambda i, k: (i, 0))],   # skip + bias
        out_specs=pl.BlockSpec((blk, Cp), lambda i, k: (i, 0)),
        scratch_shapes=[pltpu.VMEM((blk, Cp), jnp.float32),
                        pltpu.VMEM((blk, Cp), jnp.float32)],
        compiler_params=cparams,
    )(L_c, umr, umc, yp, yn, dinv_pos, dinv_neg, sb)

    return out_p[:E, :c_out]


# -----------------------------------------------------------------------------
# Module wrapper (parameter init mirrors nn.Linear reset_parameters + bias=0)
# -----------------------------------------------------------------------------
def init_dir_edge_conv_params(key, in_channels, out_channels, use_bias=True):
    kp, kn, ks = jax.random.split(key, 3)
    bound = 1.0 / jnp.sqrt(in_channels)
    # stored as (in, out) == W.T of the PyTorch (out, in) weight
    w_pos = jax.random.uniform(kp, (in_channels, out_channels), jnp.float32, -bound, bound)
    w_neg = jax.random.uniform(kn, (in_channels, out_channels), jnp.float32, -bound, bound)
    w_skip = jax.random.uniform(ks, (in_channels, out_channels), jnp.float32, -bound, bound)
    bias = jnp.zeros((out_channels,), jnp.float32) if use_bias else None
    return dict(w_pos=w_pos, w_neg=w_neg, w_skip=w_skip, bias=bias)


@functools.partial(jax.jit,
                   static_argnames=("matrix_type", "num_nodes", "use_bf16"))
def dir_edge_conv_forward(params, edge_index, edge_attr, undirected_mask,
                          matrix_type, num_nodes, use_bf16=True):
    L = edge_laplacian(edge_index, undirected_mask, matrix_type, num_nodes)
    cdt = jnp.bfloat16 if use_bf16 else jnp.float32
    return dir_edge_conv_pallas(L, undirected_mask, edge_attr,
                                params["w_pos"], params["w_neg"],
                                params["w_skip"], params["bias"],
                                compute_dtype=cdt)


# -----------------------------------------------------------------------------
# Pure-JAX f32 reference (for correctness check)
# -----------------------------------------------------------------------------
def dir_edge_conv_reference(params, edge_index, edge_attr, undirected_mask,
                            matrix_type, num_nodes):
    L = edge_laplacian(edge_index, undirected_mask, matrix_type, num_nodes)
    um = undirected_mask
    Lum = um[:, None] | um[None, :]
    L_pos = jnp.where(Lum, jnp.abs(L), jnp.maximum(L, 0.0))
    L_neg = jnp.where(Lum, -jnp.abs(L), jnp.minimum(L, 0.0))

    def deg_norm(A):
        deg = jnp.sum(jnp.abs(A), axis=1)
        dinv = jnp.where(deg > 0, deg ** -0.5, 0.0)
        return dinv[:, None] * A * dinv[None, :]

    L_pos = deg_norm(L_pos)
    L_neg = deg_norm(L_neg)
    xp = edge_attr @ params["w_pos"]
    xn = edge_attr @ params["w_neg"]
    xs = edge_attr @ params["w_skip"]
    hi = jax.lax.Precision.HIGHEST
    out = (jnp.matmul(L_pos, xp, precision=hi)
           + jnp.matmul(L_neg, xn, precision=hi)
           + xs)
    if params["bias"] is not None:
        out = out + params["bias"]
    return out


if __name__ == "__main__":
    key = jax.random.PRNGKey(0)
    k_graph, k_attr, k_mask, k_param = jax.random.split(key, 4)

    # Small synthetic directed graph (E deliberately not a multiple of 128 to
    # exercise the padded-tile path; also exercises the >=2-row-tile split).
    num_nodes = 32
    num_edges = 200
    in_channels = 16
    out_channels = 32
    matrix_type = "orientation-equivariant"

    src = jax.random.randint(k_graph, (num_edges,), 0, num_nodes)
    dst = (src + 1 + jax.random.randint(
        jax.random.fold_in(k_graph, 1), (num_edges,), 0, num_nodes - 1)) % num_nodes
    edge_index = jnp.stack([src, dst], axis=0).astype(jnp.int32)       # (2, E)
    edge_attr = jax.random.normal(k_attr, (num_edges, in_channels), jnp.float32)
    undirected_mask = jax.random.bernoulli(k_mask, 0.3, (num_edges,))  # (E,) bool

    params = init_dir_edge_conv_params(k_param, in_channels, out_channels,
                                       use_bias=True)

    ref = dir_edge_conv_reference(params, edge_index, edge_attr, undirected_mask,
                                  matrix_type, num_nodes)

    # f32 MXU path: tight check against the f32 reference.
    out_f32 = dir_edge_conv_forward(params, edge_index, edge_attr,
                                    undirected_mask, matrix_type, num_nodes,
                                    use_bf16=False)
    out_f32 = jax.block_until_ready(out_f32)
    assert out_f32.shape == (num_edges, out_channels)
    assert jnp.allclose(out_f32, ref, atol=1e-3, rtol=1e-3), \
        "f32 path mismatch vs JAX reference"

    # bf16 MXU path (default / perf mode): looser tolerance (L, yp, yn in bf16).
    out_bf16 = dir_edge_conv_forward(params, edge_index, edge_attr,
                                     undirected_mask, matrix_type, num_nodes,
                                     use_bf16=True)
    out_bf16 = jax.block_until_ready(out_bf16)
    assert out_bf16.shape == (num_edges, out_channels)
    assert jnp.allclose(out_bf16, ref, atol=1e-1, rtol=1e-1), \
        "bf16 path mismatch vs JAX reference"

    print("KERNEL_OK")
</pallas_src>

<mosaic_0001>
module attributes {stable_mosaic.version = 11 : i64} {
  func.func private @main(%arg0: i32) attributes {dimension_semantics = [#tpu.dimension_semantics<core_parallel>], iteration_bounds = array<i64: 2>, tpu.core_type = #tpu.core_type<sc_scalar_subcore>, window_params = []} {
    return
  }
}

module attributes {stable_mosaic.version = 11 : i64} {
  func.func private @main(%arg0: i32) attributes {dimension_semantics = [#tpu.dimension_semantics<core_parallel>], iteration_bounds = array<i64: 2>, tpu.core_type = #tpu.core_type<sc_scalar_subcore>, window_params = []} {
    return
  }
}

module attributes {stable_mosaic.version = 11 : i64} {
  func.func @_degree_cast_kernel(%arg0: i32, %arg1: i32, %arg2: memref<128x128xf32, #tpu.memory_space<vmem>>, %arg3: memref<128x1xf32, #tpu.memory_space<vmem>>, %arg4: memref<1x128xf32, #tpu.memory_space<vmem>>, %arg5: memref<128x1xf32, #tpu.memory_space<vmem>>, %arg6: memref<128x1xf32, #tpu.memory_space<vmem>>, %arg7: memref<128x128xf32, #tpu.memory_space<vmem>>, %arg8: memref<128x1xf32, #tpu.memory_space<vmem>>, %arg9: memref<128x1xf32, #tpu.memory_space<vmem>>) attributes {dimension_semantics = [#tpu.dimension_semantics<parallel>, #tpu.dimension_semantics<arbitrary>], iteration_bounds = array<i64: 2, 2>, scalar_prefetch = 0 : i64, scratch_operands = 2 : i64, tpu.core_type = #tpu.core_type<tc>, window_params = [{transform_indices = @transform_0, window_bounds = array<i64: 128, 128>}, {transform_indices = @transform_1, window_bounds = array<i64: 128, 1>}, {transform_indices = @transform_2, window_bounds = array<i64: 1, 128>}, {transform_indices = @transform_3, window_bounds = array<i64: 128, 1>}, {transform_indices = @transform_4, window_bounds = array<i64: 128, 1>}, {transform_indices = @transform_5, window_bounds = array<i64: 128, 128>}]} {
    %c0_i32 = arith.constant 0 : i32
    %0 = arith.cmpi eq, %arg1, %c0_i32 : i32
    %1 = arith.extui %0 : i1 to i32
    %c0_i32_0 = arith.constant 0 : i32
    %2 = arith.cmpi ne, %1, %c0_i32_0 : i32
    scf.if %2 {
      %cst_19 = arith.constant 0.000000e+00 : f32
      %29 = vector.broadcast %cst_19 : f32 to vector<128x1xf32>
      %c0_20 = arith.constant 0 : index
      %c0_21 = arith.constant 0 : index
      %30 = vector.load %arg8[%c0_20, %c0_21] : memref<128x1xf32, #tpu.memory_space<vmem>>, vector<128x1xf32>
      tpu.vector_store %arg8[%c0_20, %c0_21], %29 {strides = array<i32>} : memref<128x1xf32, #tpu.memory_space<vmem>>, vector<128x1xf32>,
      %cst_22 = arith.constant 0.000000e+00 : f32
      %31 = vector.broadcast %cst_22 : f32 to vector<128x1xf32>
      %c0_23 = arith.constant 0 : index
      %c0_24 = arith.constant 0 : index
      %32 = vector.load %arg9[%c0_23, %c0_24] : memref<128x1xf32, #tpu.memory_space<vmem>>, vector<128x1xf32>
      tpu.vector_store %arg9[%c0_23, %c0_24], %31 {strides = array<i32>} : memref<128x1xf32, #tpu.memory_space<vmem>>, vector<128x1xf32>,
    } else {
    }
    %c0 = arith.constant 0 : index
    %c0_1 = arith.constant 0 : index
    %3 = vector.load %arg2[%c0, %c0_1] : memref<128x128xf32, #tpu.memory_space<vmem>>, vector<128x128xf32>
    %c0_2 = arith.constant 0 : index
    %c0_3 = arith.constant 0 : index
    %4 = vector.load %arg7[%c0_2, %c0_3] : memref<128x128xf32, #tpu.memory_space<vmem>>, vector<128x128xf32>
    tpu.vector_store %arg7[%c0_2, %c0_3], %3 {strides = array<i32>} : memref<128x128xf32, #tpu.memory_space<vmem>>, vector<128x128xf32>,
    %c0_4 = arith.constant 0 : index
    %c0_5 = arith.constant 0 : index
    %5 = vector.load %arg3[%c0_4, %c0_5] : memref<128x1xf32, #tpu.memory_space<vmem>>, vector<128x1xf32>
    %c0_6 = arith.constant 0 : index
    %c0_7 = arith.constant 0 : index
    %6 = vector.load %arg4[%c0_6, %c0_7] : memref<1x128xf32, #tpu.memory_space<vmem>>, vector<1x128xf32>
    %7 = vector.broadcast %5 : vector<128x1xf32> to vector<128x128xf32>
    %8 = vector.broadcast %6 : vector<1x128xf32> to vector<128x128xf32>
    %9 = arith.maximumf %7, %8 : vector<128x128xf32>
    %10 = math.absf %3 : vector<128x128xf32>
    %11 = arith.mulf %10, %9 : vector<128x128xf32>
    %12 = arith.maximumf %3, %11 : vector<128x128xf32>
    %cst = arith.constant 0.000000e+00 : f32
    %13 = vector.broadcast %cst : f32 to vector<128x128xf32>
    %14 = arith.subf %13, %3 : vector<128x128xf32>
    %15 = arith.maximumf %14, %11 : vector<128x128xf32>
    %c0_8 = arith.constant 0 : index
    %c0_9 = arith.constant 0 : index
    %16 = vector.load %arg8[%c0_8, %c0_9] : memref<128x1xf32, #tpu.memory_space<vmem>>, vector<128x1xf32>
    %cst_10 = arith.constant dense<0.000000e+00> : vector<128xf32>
    %17 = vector.multi_reduction <add>, %12, %cst_10 [1] : vector<128x128xf32> to vector<128xf32>
    %18 = vector.shape_cast %17 : vector<128xf32> to vector<128x1xf32>
    %19 = arith.addf %16, %18 : vector<128x1xf32>
    %c0_11 = arith.constant 0 : index
    %c0_12 = arith.constant 0 : index
    %20 = vector.load %arg8[%c0_11, %c0_12] : memref<128x1xf32, #tpu.memory_space<vmem>>, vector<128x1xf32>
    tpu.vector_store %arg8[%c0_11, %c0_12], %19 {strides = array<i32>} : memref<128x1xf32, #tpu.memory_space<vmem>>, vector<128x1xf32>,
    %c0_13 = arith.constant 0 : index
    %c0_14 = arith.constant 0 : index
    %21 = vector.load %arg9[%c0_13, %c0_14] : memref<128x1xf32, #tpu.memory_space<vmem>>, vector<128x1xf32>
    %cst_15 = arith.constant dense<0.000000e+00> : vector<128xf32>
    %22 = vector.multi_reduction <add>, %15, %cst_15 [1] : vector<128x128xf32> to vector<128xf32>
    %23 = vector.shape_cast %22 : vector<128xf32> to vector<128x1xf32>
    %24 = arith.addf %21, %23 : vector<128x1xf32>
    %c0_16 = arith.constant 0 : index
    %c0_17 = arith.constant 0 : index
    %25 = vector.load %arg9[%c0_16, %c0_17] : memref<128x1xf32, #tpu.memory_space<vmem>>, vector<128x1xf32>
    tpu.vector_store %arg9[%c0_16, %c0_17], %24 {strides = array<i32>} : memref<128x1xf32, #tpu.memory_space<vmem>>, vector<128x1xf32>,
    %c1_i32 = arith.constant 1 : i32
    %26 = arith.cmpi eq, %arg1, %c1_i32 : i32
    %27 = arith.extui %26 : i1 to i32
    %c0_i32_18 = arith.constant 0 : i32
    %28 = arith.cmpi ne, %27, %c0_i32_18 : i32
    scf.if %28 {
      %c0_19 = arith.constant 0 : index
      %c0_20 = arith.constant 0 : index
      %29 = vector.load %arg8[%c0_19, %c0_20] : memref<128x1xf32, #tpu.memory_space<vmem>>, vector<128x1xf32>
      %c0_21 = arith.constant 0 : index
      %c0_22 = arith.constant 0 : index
      %30 = vector.load %arg9[%c0_21, %c0_22] : memref<128x1xf32, #tpu.memory_space<vmem>>, vector<128x1xf32>
      %cst_23 = arith.constant 0.000000e+00 : f32
      %31 = vector.broadcast %cst_23 : f32 to vector<128x1xf32>
      %32 = arith.cmpf ogt, %29, %31 : vector<128x1xf32>
      %33 = math.rsqrt %29 : vector<128x1xf32>
      %cst_24 = arith.constant 0.000000e+00 : f32
      %34 = vector.broadcast %cst_24 : f32 to vector<128x1xf32>
      %35 = arith.select %32, %33, %34 : vector<128x1xi1>, vector<128x1xf32>
      %c0_25 = arith.constant 0 : index
      %c0_26 = arith.constant 0 : index
      %36 = vector.load %arg5[%c0_25, %c0_26] : memref<128x1xf32, #tpu.memory_space<vmem>>, vector<128x1xf32>
      tpu.vector_store %arg5[%c0_25, %c0_26], %35 {strides = array<i32>} : memref<128x1xf32, #tpu.memory_space<vmem>>, vector<128x1xf32>,
      %cst_27 = arith.constant 0.000000e+00 : f32
      %37 = vector.broadcast %cst_27 : f32 to vector<128x1xf32>
      %38 = arith.cmpf ogt, %30, %37 : vector<128x1xf32>
      %39 = math.rsqrt %30 : vector<128x1xf32>
      %cst_28 = arith.constant 0.000000e+00 : f32
      %40 = vector.broadcast %cst_28 : f32 to vector<128x1xf32>
      %41 = arith.select %38, %39, %40 : vector<128x1xi1>, vector<128x1xf32>
      %c0_29 = arith.constant 0 : index
      %c0_30 = arith.constant 0 : index
      %42 = vector.load %arg6[%c0_29, %c0_30] : memref<128x1xf32, #tpu.memory_space<vmem>>, vector<128x1xf32>
      tpu.vector_store %arg6[%c0_29, %c0_30], %41 {strides = array<i32>} : memref<128x1xf32, #tpu.memory_space<vmem>>, vector<128x1xf32>,
    } else {
    }
    return
  }
  func.func @transform_0(%arg0: i32, %arg1: i32) -> (i32, i32) {
    %c0_i32 = arith.constant 0 : i32
    return %arg0, %arg1 : i32, i32
  }
  func.func @transform_1(%arg0: i32, %arg1: i32) -> (i32, i32) {
    %c0_i32 = arith.constant 0 : i32
    %c0_i32_0 = arith.constant 0 : i32
    return %arg0, %c0_i32 : i32, i32
  }
  func.func @transform_2(%arg0: i32, %arg1: i32) -> (i32, i32) {
    %c0_i32 = arith.constant 0 : i32
    %c0_i32_0 = arith.constant 0 : i32
    return %c0_i32, %arg1 : i32, i32
  }
  func.func @transform_3(%arg0: i32, %arg1: i32) -> (i32, i32) {
    %c0_i32 = arith.constant 0 : i32
    %c0_i32_0 = arith.constant 0 : i32
    return %arg0, %c0_i32 : i32, i32
  }
  func.func @transform_4(%arg0: i32, %arg1: i32) -> (i32, i32) {
    %c0_i32 = arith.constant 0 : i32
    %c0_i32_0 = arith.constant 0 : i32
    return %arg0, %c0_i32 : i32, i32
  }
  func.func @transform_5(%arg0: i32, %arg1: i32) -> (i32, i32) {
    %c0_i32 = arith.constant 0 : i32
    return %arg0, %arg1 : i32, i32
  }
}

module attributes {stable_mosaic.version = 11 : i64} {
  func.func @_dir_edge_conv_kernel(%arg0: i32, %arg1: i32, %arg2: memref<128x128xf32, #tpu.memory_space<vmem>>, %arg3: memref<128x1xf32, #tpu.memory_space<vmem>>, %arg4: memref<1x128xf32, #tpu.memory_space<vmem>>, %arg5: memref<256x128xf32, #tpu.memory_space<vmem>>, %arg6: memref<256x128xf32, #tpu.memory_space<vmem>>, %arg7: memref<128x1xf32, #tpu.memory_space<vmem>>, %arg8: memref<128x1xf32, #tpu.memory_space<vmem>>, %arg9: memref<128x128xf32, #tpu.memory_space<vmem>>, %arg10: memref<128x128xf32, #tpu.memory_space<vmem>>, %arg11: memref<128x128xf32, #tpu.memory_space<vmem>>, %arg12: memref<128x128xf32, #tpu.memory_space<vmem>>) attributes {dimension_semantics = [#tpu.dimension_semantics<parallel>, #tpu.dimension_semantics<arbitrary>], iteration_bounds = array<i64: 2, 2>, scalar_prefetch = 0 : i64, scratch_operands = 2 : i64, tpu.core_type = #tpu.core_type<tc>, window_params = [{transform_indices = @transform_0, window_bounds = array<i64: 128, 128>}, {transform_indices = @transform_1, window_bounds = array<i64: 128, 1>}, {transform_indices = @transform_2, window_bounds = array<i64: 1, 128>}, {pipeline_mode = #tpu.pipeline_mode<synchronous>, transform_indices = @transform_3, window_bounds = array<i64: 256, 128>}, {pipeline_mode = #tpu.pipeline_mode<synchronous>, transform_indices = @transform_4, window_bounds = array<i64: 256, 128>}, {transform_indices = @transform_5, window_bounds = array<i64: 128, 1>}, {transform_indices = @transform_6, window_bounds = array<i64: 128, 1>}, {transform_indices = @transform_7, window_bounds = array<i64: 128, 128>}, {transform_indices = @transform_8, window_bounds = array<i64: 128, 128>}]} {
    %c0_i32 = arith.constant 0 : i32
    %0 = arith.cmpi eq, %arg1, %c0_i32 : i32
    %1 = arith.extui %0 : i1 to i32
    %c0_i32_0 = arith.constant 0 : i32
    %2 = arith.cmpi ne, %1, %c0_i32_0 : i32
    scf.if %2 {
      %cst_19 = arith.constant 0.000000e+00 : f32
      %32 = vector.broadcast %cst_19 : f32 to vector<128x128xf32>
      %c0_20 = arith.constant 0 : index
      %c0_21 = arith.constant 0 : index
      %33 = vector.load %arg11[%c0_20, %c0_21] : memref<128x128xf32, #tpu.memory_space<vmem>>, vector<128x128xf32>
      tpu.vector_store %arg11[%c0_20, %c0_21], %32 {strides = array<i32>} : memref<128x128xf32, #tpu.memory_space<vmem>>, vector<128x128xf32>,
      %cst_22 = arith.constant 0.000000e+00 : f32
      %34 = vector.broadcast %cst_22 : f32 to vector<128x128xf32>
      %c0_23 = arith.constant 0 : index
      %c0_24 = arith.constant 0 : index
      %35 = vector.load %arg12[%c0_23, %c0_24] : memref<128x128xf32, #tpu.memory_space<vmem>>, vector<128x128xf32>
      tpu.vector_store %arg12[%c0_23, %c0_24], %34 {strides = array<i32>} : memref<128x128xf32, #tpu.memory_space<vmem>>, vector<128x128xf32>,
    } else {
    }
    %c0 = arith.constant 0 : index
    %c0_1 = arith.constant 0 : index
    %3 = vector.load %arg2[%c0, %c0_1] : memref<128x128xf32, #tpu.memory_space<vmem>>, vector<128x128xf32>
    %c0_2 = arith.constant 0 : index
    %c0_3 = arith.constant 0 : index
    %4 = vector.load %arg3[%c0_2, %c0_3] : memref<128x1xf32, #tpu.memory_space<vmem>>, vector<128x1xf32>
    %c0_4 = arith.constant 0 : index
    %c0_5 = arith.constant 0 : index
    %5 = vector.load %arg4[%c0_4, %c0_5] : memref<1x128xf32, #tpu.memory_space<vmem>>, vector<1x128xf32>
    %6 = vector.broadcast %4 : vector<128x1xf32> to vector<128x128xf32>
    %7 = vector.broadcast %5 : vector<1x128xf32> to vector<128x128xf32>
    %8 = arith.maximumf %6, %7 : vector<128x128xf32>
    %9 = math.absf %3 : vector<128x128xf32>
    %10 = arith.mulf %9, %8 : vector<128x128xf32>
    %11 = arith.maximumf %3, %10 : vector<128x128xf32>
    %cst = arith.constant 0.000000e+00 : f32
    %12 = vector.broadcast %cst : f32 to vector<128x128xf32>
    %13 = arith.subf %12, %10 : vector<128x128xf32>
    %14 = arith.minimumf %3, %13 : vector<128x128xf32>
    %c128_i32 = arith.constant 128 : i32
    %15 = arith.muli %arg1, %c128_i32 : i32
    %16 = tpu.assume_multiple %15, 128 : i32
    %17 = arith.index_cast %16 : i32 to index
    %c0_6 = arith.constant 0 : index
    %18 = vector.load %arg5[%17, %c0_6] : memref<256x128xf32, #tpu.memory_space<vmem>>, vector<128x128xf32>
    %19 = arith.index_cast %16 : i32 to index
    %c0_7 = arith.constant 0 : index
    %20 = vector.load %arg6[%19, %c0_7] : memref<256x128xf32, #tpu.memory_space<vmem>>, vector<128x128xf32>
    %c0_8 = arith.constant 0 : index
    %c0_9 = arith.constant 0 : index
    %21 = vector.load %arg11[%c0_8, %c0_9] : memref<128x128xf32, #tpu.memory_space<vmem>>, vector<128x128xf32>
    %cst_10 = arith.constant dense<0.000000e+00> : vector<128x128xf32>
    %22 = tpu.matmul %11, %18, %cst_10 {dimension_numbers = #tpu.dot_dimension_numbers<[1], [0], [0], [1], [0, 0, 1, 1], [], []>} : vector<128x128xf32>, vector<128x128xf32>, vector<128x128xf32> -> vector<128x128xf32>
    %23 = arith.addf %21, %22 : vector<128x128xf32>
    %c0_11 = arith.constant 0 : index
    %c0_12 = arith.constant 0 : index
    %24 = vector.load %arg11[%c0_11, %c0_12] : memref<128x128xf32, #tpu.memory_space<vmem>>, vector<128x128xf32>
    tpu.vector_store %arg11[%c0_11, %c0_12], %23 {strides = array<i32>} : memref<128x128xf32, #tpu.memory_space<vmem>>, vector<128x128xf32>,
    %c0_13 = arith.constant 0 : index
    %c0_14 = arith.constant 0 : index
    %25 = vector.load %arg12[%c0_13, %c0_14] : memref<128x128xf32, #tpu.memory_space<vmem>>, vector<128x128xf32>
    %cst_15 = arith.constant dense<0.000000e+00> : vector<128x128xf32>
    %26 = tpu.matmul %14, %20, %cst_15 {dimension_numbers = #tpu.dot_dimension_numbers<[1], [0], [0], [1], [0, 0, 1, 1], [], []>} : vector<128x128xf32>, vector<128x128xf32>, vector<128x128xf32> -> vector<128x128xf32>
    %27 = arith.addf %25, %26 : vector<128x128xf32>
    %c0_16 = arith.constant 0 : index
    %c0_17 = arith.constant 0 : index
    %28 = vector.load %arg12[%c0_16, %c0_17] : memref<128x128xf32, #tpu.memory_space<vmem>>, vector<128x128xf32>
    tpu.vector_store %arg12[%c0_16, %c0_17], %27 {strides = array<i32>} : memref<128x128xf32, #tpu.memory_space<vmem>>, vector<128x128xf32>,
    %c1_i32 = arith.constant 1 : i32
    %29 = arith.cmpi eq, %arg1, %c1_i32 : i32
    %30 = arith.extui %29 : i1 to i32
    %c0_i32_18 = arith.constant 0 : i32
    %31 = arith.cmpi ne, %30, %c0_i32_18 : i32
    scf.if %31 {
      %c0_19 = arith.constant 0 : index
      %c0_20 = arith.constant 0 : index
      %32 = vector.load %arg7[%c0_19, %c0_20] : memref<128x1xf32, #tpu.memory_space<vmem>>, vector<128x1xf32>
      %c0_21 = arith.constant 0 : index
      %c0_22 = arith.constant 0 : index
      %33 = vector.load %arg11[%c0_21, %c0_22] : memref<128x128xf32, #tpu.memory_space<vmem>>, vector<128x128xf32>
      %34 = vector.broadcast %32 : vector<128x1xf32> to vector<128x128xf32>
      %35 = arith.mulf %34, %33 : vector<128x128xf32>
      %c0_23 = arith.constant 0 : index
      %c0_24 = arith.constant 0 : index
      %36 = vector.load %arg8[%c0_23, %c0_24] : memref<128x1xf32, #tpu.memory_space<vmem>>, vector<128x1xf32>
      %c0_25 = arith.constant 0 : index
      %c0_26 = arith.constant 0 : index
      %37 = vector.load %arg12[%c0_25, %c0_26] : memref<128x128xf32, #tpu.memory_space<vmem>>, vector<128x128xf32>
      %38 = vector.broadcast %36 : vector<128x1xf32> to vector<128x128xf32>
      %39 = arith.mulf %38, %37 : vector<128x128xf32>
      %40 = arith.addf %35, %39 : vector<128x128xf32>
      %c0_27 = arith.constant 0 : index
      %c0_28 = arith.constant 0 : index
      %41 = vector.load %arg9[%c0_27, %c0_28] : memref<128x128xf32, #tpu.memory_space<vmem>>, vector<128x128xf32>
      %42 = arith.addf %40, %41 : vector<128x128xf32>
      %c0_29 = arith.constant 0 : index
      %c0_30 = arith.constant 0 : index
      %43 = vector.load %arg10[%c0_29, %c0_30] : memref<128x128xf32, #tpu.memory_space<vmem>>, vector<128x128xf32>
      tpu.vector_store %arg10[%c0_29, %c0_30], %42 {strides = array<i32>} : memref<128x128xf32, #tpu.memory_space<vmem>>, vector<128x128xf32>,
    } else {
    }
    return
  }
  func.func @transform_0(%arg0: i32, %arg1: i32) -> (i32, i32) {
    %c0_i32 = arith.constant 0 : i32
    return %arg0, %arg1 : i32, i32
  }
  func.func @transform_1(%arg0: i32, %arg1: i32) -> (i32, i32) {
    %c0_i32 = arith.constant 0 : i32
    %c0_i32_0 = arith.constant 0 : i32
    return %arg0, %c0_i32 : i32, i32
  }
  func.func @transform_2(%arg0: i32, %arg1: i32) -> (i32, i32) {
    %c0_i32 = arith.constant 0 : i32
    %c0_i32_0 = arith.constant 0 : i32
    return %c0_i32, %arg1 : i32, i32
  }
  func.func @transform_3(%arg0: i32, %arg1: i32) -> (i32, i32) {
    %c0_i32 = arith.constant 0 : i32
    %c0_i32_0 = arith.constant 0 : i32
    %c0_i32_1 = arith.constant 0 : i32
    return %c0_i32, %c0_i32_0 : i32, i32
  }
  func.func @transform_4(%arg0: i32, %arg1: i32) -> (i32, i32) {
    %c0_i32 = arith.constant 0 : i32
    %c0_i32_0 = arith.constant 0 : i32
    %c0_i32_1 = arith.constant 0 : i32
    return %c0_i32, %c0_i32_0 : i32, i32
  }
  func.func @transform_5(%arg0: i32, %arg1: i32) -> (i32, i32) {
    %c0_i32 = arith.constant 0 : i32
    %c0_i32_0 = arith.constant 0 : i32
    return %arg0, %c0_i32 : i32, i32
  }
  func.func @transform_6(%arg0: i32, %arg1: i32) -> (i32, i32) {
    %c0_i32 = arith.constant 0 : i32
    %c0_i32_0 = arith.constant 0 : i32
    return %arg0, %c0_i32 : i32, i32
  }
  func.func @transform_7(%arg0: i32, %arg1: i32) -> (i32, i32) {
    %c0_i32 = arith.constant 0 : i32
    %c0_i32_0 = arith.constant 0 : i32
    return %arg0, %c0_i32 : i32, i32
  }
  func.func @transform_8(%arg0: i32, %arg1: i32) -> (i32, i32) {
    %c0_i32 = arith.constant 0 : i32
    %c0_i32_0 = arith.constant 0 : i32
    return %arg0, %c0_i32 : i32, i32
  }
}

</mosaic_0001>

<bundles_post_ra>
// kernel: dir_edge_conv_forward.2
= control target key start
LH: loop header
LB: loop body
LE: loop exit
PB: predicated region body
PF: predicated region fallthrough
CT: control target
= control target key end

     0   :  { %s1497_s18 = smov 0   ;;  %s1499_s19 = smov 0   ;;  %s2130_s0 = inlined_call_operand.vmem [shape: f32[256,256], index: 0, kind: input, shape index: {}]   ;;  %s2131_s1 = inlined_call_operand.vmem [shape: f32[256,1], index: 1, kind: input, shape index: {}]   ;;  %s2132_s2 = inlined_call_operand.vmem [shape: f32[1,256], index: 2, kind: input, shape index: {}]   ;;  %s2133_s3 = inlined_call_operand.vmem [shape: f32[256,1], index: 3, kind: output, shape index: {0}]   ;;  %s2134_s4 = inlined_call_operand.vmem [shape: f32[256,1], index: 4, kind: output, shape index: {1}]   ;;  %s2135_s5 = inlined_call_operand.vmem [shape: f32[256,256], index: 5, kind: output, shape index: {2}]  }
   0x1   :  { %s1501_s20 = smov 0   ;;  %s1503_s21 = smov 0  }
   0x2   :  { %s1505_s22 = smov 0   ;;  %s1507_s23 = smov 0  }
   0x3   :  { %s1509_s24 = smov 0  }
   0x4 LB: > { %s25_s25 = sadd.s32 1, %s1455_s22  ;;  %s28_s26 = sadd.s32 1, %s1459_s23  ;;  %s1463_s24 = sphi %s1509_s24, %s16_s24   ;;  %s1459_s23 = sphi %s1507_s23, %s2142_s23   ;;  %s1455_s22 = sphi %s1505_s22, %s2141_s22   ;;  %s1451_s21 = sphi %s1503_s21, %s2140_s21   ;;  %s1447_s20 = sphi %s1501_s20, %s2139_s20   ;;  %s1443_s19 = sphi %s1499_s19, %s2138_s19   ;;  %s1439_s18 = sphi %s1497_s18, %s2137_s18  }
   0x5   : > { %p26_p0 = scmp.ge.s32.totalorder %s25_s25, 2  ;;  %s1257_s27 = sadd.s32 4294967295, %s1463_s24  }
   0x6   : > { %p44_p1 = scmp.ne.s32.totalorder %s1443_s19, %s1439_s18  ;;  %p45_p2 = scmp.eq.s32.totalorder %s1463_s24, 0 }
   0x7   : > { %s2144_s25 = smov (%p26_p0, %s25_s25), 0  ;;  %s2146_s26 = smov (!%p26_p0, %s28_s26), %s1459_s23 }
   0x8   : > { %p30_p3 = scmp.ge.s32.totalorder %s2146_s26, 2  ;;  %p180_p4 = scmp.eq.s32.totalorder %s1257_s27, 3 }
   0x9   : > { %s33_s28 = ssub.s32 %s1455_s22, %s2144_s25  ;;  %p46_p5 = por %p45_p2, %p44_p1 }
   0xa   : > { %s2148_s26 = smov (%p30_p3, %s2146_s26), 0  ;;  %p1545_p6 = por %p180_p4, %p44_p1 }
   0xb   : > { %s32_s30 = ssub.s32 %s1459_s23, %s2148_s26  ;;  %s37_s7 = sadd.s32 1, %s1443_s19 }
   0xc   : > { %s34_s6 = sor.u32 %s33_s28, %s32_s30  ;;  %p1260_p8 = scmp.ge.s32.totalorder %s1463_s24, 4 }
   0xd   : > { %p35_p7 = scmp.eq.s32.totalorder %s34_s6, 0 }
   0xe   : > { %202 = sbr.rel (%p1260_p8) target bundleno = 33 (0x21), region = 16 }
   0xf   : > { %s1553_s8 = scalar_select %p35_p7, %s1443_s19, %s37_s7  }
  0x13   : > { %205 = sbr.rel (!%p46_p5) target bundleno = 33 (0x21), region = 20  ;;  %s207_s9 = sand.u32 (%p46_p5), 1, %s1443_s19  }
  0x14   : > { %s1283_s10 = sshll.u32 (%p46_p5), %s1459_s23, 5  ;;  %s1261_s11 = sshll.u32 (%p46_p5), %s207_s9, 7 }
  0x15   : > { %s212_s12 = sadd.s32 (%p46_p5), %s1455_s22, %s1283_s10  ;;  %s209_s17 = scalar_lea.vmem (%p46_p5), [#allocation4], %s1261_s11 }
  0x16   : > { %s1264_s13 = sshll.u32 (%p46_p5), %s212_s12, 3 }
  0x17   : > { %s1562_s16 = scalar_lea.vmem (%p46_p5), %s2130_s0, %s1264_s13 }
  0x18   : > { %v273_v0 = vld [vmem:[%s1562_s16] sm:$0xff]  ;;  %v275_v1 = vld [vmem:[%s1562_s16 + $0x10] sm:$0xff] }
  0x19   : > { %v277_v2 = vld [vmem:[%s1562_s16 + $0x20] sm:$0xff]  ;;  %274 = vst [vmem:[%s209_s17] sm:$0xff] %v273_v0  ;;  %276 = vst [vmem:[%s209_s17 + $0x8] sm:$0xff] %v275_v1  ;;  %v279_v3 = vld [vmem:[%s1562_s16 + $0x30] sm:$0xff] }
  0x1a   : > { %278 = vst [vmem:[%s209_s17 + $0x10] sm:$0xff] %v277_v2  ;;  %v281_v4 = vld [vmem:[%s1562_s16 + $0x40] sm:$0xff]  ;;  %v283_v5 = vld [vmem:[%s1562_s16 + $0x50] sm:$0xff]  ;;  %280 = vst [vmem:[%s209_s17 + $0x18] sm:$0xff] %v279_v3 }
  0x1b   : > { %282 = vst [vmem:[%s209_s17 + $0x20] sm:$0xff] %v281_v4  ;;  %284 = vst [vmem:[%s209_s17 + $0x28] sm:$0xff] %v283_v5  ;;  %v285_v6 = vld [vmem:[%s1562_s16 + $0x60] sm:$0xff]  ;;  %v287_v7 = vld [vmem:[%s1562_s16 + $0x70] sm:$0xff] }
  0x1c   : > { %v289_v8 = vld [vmem:[%s1562_s16 + $0x80] sm:$0xff]  ;;  %286 = vst [vmem:[%s209_s17 + $0x30] sm:$0xff] %v285_v6  ;;  %288 = vst [vmem:[%s209_s17 + $0x38] sm:$0xff] %v287_v7  ;;  %v291_v9 = vld [vmem:[%s1562_s16 + $0x90] sm:$0xff] }
  0x1d   : > { %290 = vst [vmem:[%s209_s17 + $0x40] sm:$0xff] %v289_v8  ;;  %v293_v10 = vld [vmem:[%s1562_s16 + $0xa0] sm:$0xff]  ;;  %v295_v11 = vld [vmem:[%s1562_s16 + $0xb0] sm:$0xff]  ;;  %292 = vst [vmem:[%s209_s17 + $0x48] sm:$0xff] %v291_v9 }
  0x1e   : > { %294 = vst [vmem:[%s209_s17 + $0x50] sm:$0xff] %v293_v10  ;;  %296 = vst [vmem:[%s209_s17 + $0x58] sm:$0xff] %v295_v11  ;;  %v297_v12 = vld [vmem:[%s1562_s16 + $0xc0] sm:$0xff]  ;;  %v299_v13 = vld [vmem:[%s1562_s16 + $0xd0] sm:$0xff] }
  0x1f   : > { %v301_v14 = vld [vmem:[%s1562_s16 + $0xe0] sm:$0xff]  ;;  %298 = vst [vmem:[%s209_s17 + $0x60] sm:$0xff] %v297_v12  ;;  %300 = vst [vmem:[%s209_s17 + $0x68] sm:$0xff] %v299_v13  ;;  %v303_v15 = vld [vmem:[%s1562_s16 + $0xf0] sm:$0xff] }
  0x20   : > { %302 = vst [vmem:[%s209_s17 + $0x70] sm:$0xff] %v301_v14  ;;  %304 = vst [vmem:[%s209_s17 + $0x78] sm:$0xff] %v303_v15 }
  0x21 PF: > { %p1265_p9 = scmp.ge.s32.totalorder %s1463_s24, 1  ;;  %p324_p10 = scmp.lt.s32.totalorder %s1463_s24, 5 }
  0x23   : > { %p325_p11 = pnand %p1265_p9, %p324_p10 }
  0x24   : > { %s331_s27 = sand.u32 (!%p325_p11), 1, %s1439_s18   ;;  %s1268_s28 = sshll.u32 (!%p325_p11), %s1451_s21, 4 }
  0x25   : > { %328 = sbr.rel (%p325_p11) target bundleno = 462 (0x1ce), region = 66  ;;  %s1266_s30 = sshll.u32 (!%p325_p11), %s331_s27, 7 }
  0x26   : > { %p377_p12 = scmp.lt.s32.totalorder (!%p325_p11), %s1268_s28, 31  ;;  %p382_p13 = scmp.lt.s32.totalorder (!%p325_p11), %s1447_s20, 1 }
  0x27   : > { %s1607_s7 = scalar_lea.vmem (!%p325_p11), [#allocation4], %s1266_s30  ;;  %s1609_s9 = scalar_lea.vmem (!%p325_p11), [#allocation5], %s1266_s30 }
  0x28   : > { %p1274_p0 = scmp.ne.s32.totalorder (!%p325_p11), %s1447_s20, 0 }
  0x2a   : > { %s2150_s28 = smov (!%p377_p12, %s1268_s28), 31 }
  0x2b   : > { %s1269_s6 = sshll.u32 %s2150_s28, 3  ;;  %401 = sbr.rel (%p1274_p0) target bundleno = 65 (0x41), region = 74 }
  0x2c   : > { %s1588_s10 = scalar_lea.vmem %s2131_s1, %s1269_s6  ;;  %s1593_s13 = scalar_lea.vmem %s2133_s3, %s1269_s6 }
  0x2d   : > { %s1596_s14 = scalar_select %p382_p13, %s1447_s20, 1 }
  0x2e   : > { %s1601_s16 = scalar_lea.vmem %s2134_s4, %s1269_s6 }
  0x2f   : > { %s384_s28 = scalar_lea.vmem %s2132_s2, %s1596_s14 }
  0x30   : > { %vm402_vm0 = vcmask 7168   ;;  %v1465_v16 = vmov 0.0  }
  0x31   : > { %403 = vst.msk [vmem:[#allocation2] sm:$0xff] %vm402_vm0, %v1465_v16  ;;  %404 = vst.msk [vmem:[#allocation2 + $0x8] sm:$0xff] %vm402_vm0, %v1465_v16 }
  0x32   : > { %405 = vst.msk [vmem:[#allocation2 + $0x10] sm:$0xff] %vm402_vm0, %v1465_v16  ;;  %406 = vst.msk [vmem:[#allocation2 + $0x18] sm:$0xff] %vm402_vm0, %v1465_v16 }
  0x33   : > { %407 = vst.msk [vmem:[#allocation2 + $0x20] sm:$0xff] %vm402_vm0, %v1465_v16  ;;  %408 = vst.msk [vmem:[#allocation2 + $0x28] sm:$0xff] %vm402_vm0, %v1465_v16 }
  0x34   : > { %409 = vst.msk [vmem:[#allocation2 + $0x30] sm:$0xff] %vm402_vm0, %v1465_v16  ;;  %410 = vst.msk [vmem:[#allocation2 + $0x38] sm:$0xff] %vm402_vm0, %v1465_v16 }
  0x35   : > { %411 = vst.msk [vmem:[#allocation2 + $0x40] sm:$0xff] %vm402_vm0, %v1465_v16  ;;  %412 = vst.msk [vmem:[#allocation2 + $0x48] sm:$0xff] %vm402_vm0, %v1465_v16 }
  0x36   : > { %413 = vst.msk [vmem:[#allocation2 + $0x50] sm:$0xff] %vm402_vm0, %v1465_v16  ;;  %414 = vst.msk [vmem:[#allocation2 + $0x58] sm:$0xff] %vm402_vm0, %v1465_v16 }
  0x37   : > { %415 = vst.msk [vmem:[#allocation2 + $0x60] sm:$0xff] %vm402_vm0, %v1465_v16  ;;  %416 = vst.msk [vmem:[#allocation2 + $0x68] sm:$0xff] %vm402_vm0, %v1465_v16 }
  0x38   : > { %417 = vst.msk [vmem:[#allocation2 + $0x70] sm:$0xff] %vm402_vm0, %v1465_v16  ;;  %418 = vst.msk [vmem:[#allocation2 + $0x78] sm:$0xff] %vm402_vm0, %v1465_v16 }
  0x39   : > { %419 = vst.msk [vmem:[#allocation3] sm:$0xff] %vm402_vm0, %v1465_v16  ;;  %420 = vst.msk [vmem:[#allocation3 + $0x8] sm:$0xff] %vm402_vm0, %v1465_v16 }
  0x3a   : > { %421 = vst.msk [vmem:[#allocation3 + $0x10] sm:$0xff] %vm402_vm0, %v1465_v16  ;;  %422 = vst.msk [vmem:[#allocation3 + $0x18] sm:$0xff] %vm402_vm0, %v1465_v16 }
  0x3b   : > { %423 = vst.msk [vmem:[#allocation3 + $0x20] sm:$0xff] %vm402_vm0, %v1465_v16  ;;  %424 = vst.msk [vmem:[#allocation3 + $0x28] sm:$0xff] %vm402_vm0, %v1465_v16 }
  0x3c   : > { %425 = vst.msk [vmem:[#allocation3 + $0x30] sm:$0xff] %vm402_vm0, %v1465_v16  ;;  %426 = vst.msk [vmem:[#allocation3 + $0x38] sm:$0xff] %vm402_vm0, %v1465_v16 }
  0x3d   : > { %427 = vst.msk [vmem:[#allocation3 + $0x40] sm:$0xff] %vm402_vm0, %v1465_v16  ;;  %428 = vst.msk [vmem:[#allocation3 + $0x48] sm:$0xff] %vm402_vm0, %v1465_v16 }
  0x3e   : > { %429 = vst.msk [vmem:[#allocation3 + $0x50] sm:$0xff] %vm402_vm0, %v1465_v16  ;;  %430 = vst.msk [vmem:[#allocation3 + $0x58] sm:$0xff] %vm402_vm0, %v1465_v16 }
  0x3f   : > { %431 = vst.msk [vmem:[#allocation3 + $0x60] sm:$0xff] %vm402_vm0, %v1465_v16  ;;  %432 = vst.msk [vmem:[#allocation3 + $0x68] sm:$0xff] %vm402_vm0, %v1465_v16 }
  0x40   : > { %433 = vst.msk [vmem:[#allocation3 + $0x70] sm:$0xff] %vm402_vm0, %v1465_v16  ;;  %434 = vst.msk [vmem:[#allocation3 + $0x78] sm:$0xff] %vm402_vm0, %v1465_v16 }
  0x41 PF: > { %v469_v17 = vld [vmem:[%s1588_s10 + $0x10] sm:$0xff]  ;;  %v467_v18 = vld [vmem:[%s1588_s10] sm:$0xff]  ;;  %v1466_v19 = vmov 0   ;;  %v470_v20 = vld [vmem:[%s1588_s10 + $0x18] sm:$0xff]  ;;  %vm730_vm1 = vcmask 7168   ;;  %p1276_p1 = scmp.ne.s32.totalorder %s1447_s20, 1 }
  0x42   : > { %1344 = vset.pattern.permute.xlu1 %v1466_v19  ;;  %1343 = vset.pattern.permute.xlu0 %v1466_v19  ;;  %v468_v21 = vld [vmem:[%s1588_s10 + $0x8] sm:$0xff]  ;;  %v1649_v22 = vld [vmem:[%s1607_s7 + $0x10] sm:$0xff]  ;;  %v1654_v23 = vld [vmem:[%s1607_s7] sm:$0xff] }
  0x43   : > { %496 = vperm.xlu1 %1344, %v469_v17   ;;  %486 = vperm.xlu0 %1343, %v467_v18   ;;  %453 = vst [vmem:[%s1609_s9 + $0x10] sm:$0xff] %v1649_v22  ;;  %v1657_v24 = vld [vmem:[%s1607_s7 + $0x18] sm:$0xff]  ;;  %v1660_v25 = vld [vmem:[%s1607_s7 + $0x8] sm:$0xff]  ;;  %v471_v27 = vld [vmem:[%s1588_s10 + $0x20] sm:$0xff]  ;;  %v588_v51 = vand.u32 2147483647, %v1649_v22 }
  0x44   : > { %v472_v26 = vld [vmem:[%s1588_s10 + $0x28] sm:$0xff]  ;;  %451 = vst [vmem:[%s1609_s9] sm:$0xff] %v1654_v23  ;;  %454 = vst [vmem:[%s1609_s9 + $0x18] sm:$0xff] %v1657_v24  ;;  %v1671_v28 = vld [vmem:[%s1607_s7 + $0x28] sm:$0xff]  ;;  %v586_v52 = vand.u32 2147483647, %v1654_v23 }
  0x45   : > { %452 = vst [vmem:[%s1609_s9 + $0x8] sm:$0xff] %v1660_v25  ;;  %v1674_v29 = vld [vmem:[%s1607_s7 + $0x20] sm:$0xff]  ;;  %456 = vst [vmem:[%s1609_s9 + $0x28] sm:$0xff] %v1671_v28  ;;  %v1681_v30 = vld [vmem:[%s1607_s7 + $0x38] sm:$0xff]  ;;  %v587_v59 = vand.u32 2147483647, %v1660_v25 }
  0x46   : > { %455 = vst [vmem:[%s1609_s9 + $0x20] sm:$0xff] %v1674_v29  ;;  %v1684_v31 = vld [vmem:[%s1607_s7 + $0x30] sm:$0xff]  ;;  %458 = vst [vmem:[%s1609_s9 + $0x38] sm:$0xff] %v1681_v30  ;;  %v474_v32 = vld [vmem:[%s1588_s10 + $0x38] sm:$0xff]  ;;  %v589_v61 = vand.u32 2147483647, %v1657_v24 }
  0x47   : > { %501 = vperm.xlu1 %1344, %v470_v20   ;;  %491 = vperm.xlu0 %1343, %v468_v21   ;;  %457 = vst [vmem:[%s1609_s9 + $0x30] sm:$0xff] %v1684_v31  ;;  %v473_v33 = vld [vmem:[%s1588_s10 + $0x30] sm:$0xff]  ;;  %v1693_v34 = vld [vmem:[%s1607_s7 + $0x48] sm:$0xff]  ;;  %v476_v36 = vld [vmem:[%s1588_s10 + $0x48] sm:$0xff]  ;;  %v590_v3 = vand.u32 2147483647, %v1674_v29 }
  0x48   : > { %v1696_v35 = vld [vmem:[%s1607_s7 + $0x40] sm:$0xff]  ;;  %460 = vst [vmem:[%s1609_s9 + $0x48] sm:$0xff] %v1693_v34  ;;  %v475_v37 = vld [vmem:[%s1588_s10 + $0x40] sm:$0xff]  ;;  %v1705_v38 = vld [vmem:[%s1607_s7 + $0x58] sm:$0xff]  ;;  %v591_v9 = vand.u32 2147483647, %v1671_v28 }
  0x49   : > { %459 = vst [vmem:[%s1609_s9 + $0x40] sm:$0xff] %v1696_v35  ;;  %v1708_v39 = vld [vmem:[%s1607_s7 + $0x50] sm:$0xff]  ;;  %462 = vst [vmem:[%s1609_s9 + $0x58] sm:$0xff] %v1705_v38  ;;  %v478_v40 = vld [vmem:[%s1588_s10 + $0x58] sm:$0xff]  ;;  %v592_v13 = vand.u32 2147483647, %v1684_v31 }
  0x4a   : > { %461 = vst [vmem:[%s1609_s9 + $0x50] sm:$0xff] %v1708_v39  ;;  %v477_v41 = vld [vmem:[%s1588_s10 + $0x50] sm:$0xff]  ;;  %v1717_v42 = vld [vmem:[%s1607_s7 + $0x68] sm:$0xff]  ;;  %v480_v44 = vld [vmem:[%s1588_s10 + $0x68] sm:$0xff]  ;;  %v593_v15 = vand.u32 2147483647, %v1681_v30 }
  0x4b   : > { %511 = vperm.xlu1 %1344, %v472_v26   ;;  %506 = vperm.xlu0 %1343, %v471_v27   ;;  %v1720_v43 = vld [vmem:[%s1607_s7 + $0x60] sm:$0xff]  ;;  %464 = vst [vmem:[%s1609_s9 + $0x68] sm:$0xff] %v1717_v42  ;;  %v479_v45 = vld [vmem:[%s1588_s10 + $0x60] sm:$0xff]  ;;  %v1729_v46 = vld [vmem:[%s1607_s7 + $0x78] sm:$0xff]  ;;  %v594_v27 = vand.u32 2147483647, %v1696_v35 }
  0x4c   : > { %463 = vst [vmem:[%s1609_s9 + $0x60] sm:$0xff] %v1720_v43  ;;  %v1732_v47 = vld [vmem:[%s1607_s7 + $0x70] sm:$0xff]  ;;  %466 = vst [vmem:[%s1609_s9 + $0x78] sm:$0xff] %v1729_v46  ;;  %v482_v48 = vld [vmem:[%s1588_s10 + $0x78] sm:$0xff] }
  0x4d   : > { %465 = vst [vmem:[%s1609_s9 + $0x70] sm:$0xff] %v1732_v47  ;;  %v481_v49 = vld [vmem:[%s1588_s10 + $0x70] sm:$0xff]  ;;  %v1745_v50 = vld [vmem:[%s384_s28] ss:$0 sm:$0xff] }
  0x4f   : > { %521 = vperm.xlu1 %1344, %v474_v32   ;;  %516 = vperm.xlu0 %1343, %v473_v33  }
  0x53   : > { %531 = vperm.xlu1 %1344, %v476_v36   ;;  %526 = vperm.xlu0 %1343, %v475_v37   ;;  %v595_v36 = vand.u32 2147483647, %v1693_v34 }
  0x57   : > { %541 = vperm.xlu1 %1344, %v478_v40   ;;  %536 = vperm.xlu0 %1343, %v477_v41  }
  0x5b   : > { %551 = vperm.xlu1 %1344, %v480_v44   ;;  %546 = vperm.xlu0 %1343, %v479_v45  }
  0x5f   : > { %561 = vperm.xlu1 %1344, %v482_v48   ;;  %556 = vperm.xlu0 %1343, %v481_v49   ;;  %v596_v49 = vand.u32 2147483647, %v1708_v39 }
  0xbe   : > { %v497_v53 = vpop.permute.xlu1 %496  ;;  %v487_v54 = vpop.permute.xlu0 %486 }
  0xbf   : > { %v572_v55 = vmax.f32 %v497_v53, %v1745_v50  ;;  %v570_v56 = vmax.f32 %v487_v54, %v1745_v50 }
  0xc1   : > { %v1751_v57 = vmul.f32 %v588_v51, %v572_v55  ;;  %v1753_v58 = vmul.f32 %v586_v52, %v570_v56  ;;  %v597_v52 = vand.u32 2147483647, %v1705_v38 }
  0xc2   : > { %v502_v60 = vpop.permute.xlu1 %501  ;;  %v492_v62 = vpop.permute.xlu0 %491 }
  0xc3   : > { %v573_v63 = vmax.f32 %v502_v60, %v1745_v50  ;;  %v571_v0 = vmax.f32 %v492_v62, %v1745_v50  ;;  %v618_v1 = vmax.f32 %v1654_v23, %v1753_v58  ;;  %v620_v4 = vmax.f32 %v1649_v22, %v1751_v57 }
  0xc4   : > { %v598_v62 = vand.u32 2147483647, %v1720_v43 }
  0xc5   : > { %v1761_v2 = vmul.f32 %v587_v59, %v571_v0  ;;  %682 = vadd.xlane.f32.xlu0 %v618_v1  ;;  %v1766_v5 = vmul.f32 %v589_v61, %v573_v63  ;;  %v599_v1 = vand.u32 2147483647, %v1717_v42 }
  0xc6   : > { %v512_v6 = vpop.permute.xlu1 %511  ;;  %v507_v7 = vpop.permute.xlu0 %506 }
  0xc7   : > { %v575_v8 = vmax.f32 %v512_v6, %v1745_v50  ;;  %v574_v10 = vmax.f32 %v507_v7, %v1745_v50  ;;  %v619_v11 = vmax.f32 %v1660_v25, %v1761_v2  ;;  %v621_v17 = vmax.f32 %v1657_v24, %v1766_v5 }
  0xc9   : > { %v1773_v12 = vmul.f32 %v590_v3, %v574_v10  ;;  %684 = vadd.xlane.f32.xlu1 %v619_v11  ;;  %686 = vadd.xlane.f32.xlu0 %v620_v4  ;;  %v1779_v18 = vmul.f32 %v591_v9, %v575_v8  ;;  %v600_v10 = vand.u32 2147483647, %v1732_v47 }
  0xca   : > { %v522_v14 = vpop.permute.xlu1 %521  ;;  %v517_v16 = vpop.permute.xlu0 %516 }
  0xcb   : > { %v577_v19 = vmax.f32 %v522_v14, %v1745_v50  ;;  %v576_v20 = vmax.f32 %v517_v16, %v1745_v50  ;;  %v622_v21 = vmax.f32 %v1674_v29, %v1773_v12  ;;  %v623_v45 = vmax.f32 %v1671_v28, %v1779_v18 }
  0xcd   : > { %v1785_v26 = vmul.f32 %v592_v13, %v576_v20  ;;  %690 = vadd.xlane.f32.xlu1 %v622_v21  ;;  %688 = vadd.xlane.f32.xlu0 %v621_v17  ;;  %v1788_v32 = vmul.f32 %v593_v15, %v577_v19  ;;  %v601_v13 = vand.u32 2147483647, %v1729_v46 }
  0xce   : > { %v532_v33 = vpop.permute.xlu1 %531  ;;  %v527_v37 = vpop.permute.xlu0 %526 }
  0xcf   : > { %v579_v40 = vmax.f32 %v532_v33, %v1745_v50  ;;  %v578_v41 = vmax.f32 %v527_v37, %v1745_v50  ;;  %v624_v44 = vmax.f32 %v1684_v31, %v1785_v26  ;;  %v625_v54 = vmax.f32 %v1681_v30, %v1788_v32 }
  0xd0   : > { %v634_v37 = vsub.f32 0.0, %v1654_v23  ;;  %v637_v23 = vsub.f32 0.0, %v1657_v24  ;;  %v641_v24 = vsub.f32 0.0, %v1681_v30  ;;  %v645_v30 = vsub.f32 0.0, %v1705_v38 }
  0xd1   : > { %v1797_v48 = vmul.f32 %v594_v27, %v578_v41  ;;  %694 = vadd.xlane.f32.xlu1 %v624_v44  ;;  %692 = vadd.xlane.f32.xlu0 %v623_v45  ;;  %v1803_v55 = vmul.f32 %v595_v36, %v579_v40  ;;  %v635_v44 = vsub.f32 0.0, %v1660_v25  ;;  %v639_v25 = vsub.f32 0.0, %v1671_v28 }
  0xd2   : > { %v542_v51 = vpop.permute.xlu1 %541  ;;  %v537_v53 = vpop.permute.xlu0 %536  ;;  %v650_v40 = vmax.f32 %v634_v37, %v1753_v58  ;;  %v643_v28 = vsub.f32 0.0, %v1693_v34 }
  0xd3   : > { %v581_v56 = vmax.f32 %v542_v51, %v1745_v50  ;;  %v580_v59 = vmax.f32 %v537_v53, %v1745_v50  ;;  %v626_v60 = vmax.f32 %v1696_v35, %v1797_v48  ;;  %v627_v8 = vmax.f32 %v1693_v34, %v1803_v55 }
  0xd4   : > { %v638_v51 = vsub.f32 0.0, %v1674_v29  ;;  %v642_v29 = vsub.f32 0.0, %v1696_v35  ;;  %v646_v35 = vsub.f32 0.0, %v1720_v43 }
  0xd5   : > { %v1809_v61 = vmul.f32 %v596_v49, %v580_v59  ;;  %698 = vadd.xlane.f32.xlu1 %v626_v60  ;;  %696 = vadd.xlane.f32.xlu0 %v625_v54  ;;  %v1812_v63 = vmul.f32 %v597_v52, %v581_v56  ;;  %v651_v49 = vmax.f32 %v635_v44, %v1761_v2  ;;  %v649_v56 = vsub.f32 0.0, %v1729_v46  ;;  %v667_v60 = vld [vmem:[#allocation2 + $0x8] sm:$0xff] }
  0xd6   : > { %v552_v0 = vpop.permute.xlu1 %551  ;;  %v547_v3 = vpop.permute.xlu0 %546  ;;  %v654_v58 = vmax.f32 %v638_v51, %v1773_v12  ;;  %v653_v52 = vmax.f32 %v637_v23, %v1766_v5  ;;  %v655_v2 = vmax.f32 %v639_v25, %v1779_v18  ;;  %v658_v12 = vmax.f32 %v642_v29, %v1797_v48  ;;  %v680_v23 = vld [vmem:[#allocation2 + $0x70] sm:$0xff]  ;;  %v681_v29 = vld [vmem:[#allocation2 + $0x78] sm:$0xff] }
  0xd7   : > { %v583_v4 = vmax.f32 %v552_v0, %v1745_v50  ;;  %v582_v6 = vmax.f32 %v547_v3, %v1745_v50  ;;  %v628_v7 = vmax.f32 %v1708_v39, %v1809_v61  ;;  %v629_v15 = vmax.f32 %v1705_v38, %v1812_v63  ;;  %v666_v38 = vld [vmem:[#allocation2] sm:$0xff] }
  0xd8   : > { %v657_v5 = vmax.f32 %v641_v24, %v1788_v32  ;;  %v659_v18 = vmax.f32 %v643_v28, %v1803_v55  ;;  %v661_v48 = vmax.f32 %v645_v30, %v1812_v63  ;;  %v648_v32 = vsub.f32 0.0, %v1732_v47  ;;  %v670_v0 = vld [vmem:[#allocation2 + $0x20] sm:$0xff]  ;;  %v749_v28 = vld [vmem:[#allocation3 + $0x10] sm:$0xff] }
  0xd9   : > { %v614_v9 = vmul.f32 %v598_v62, %v582_v6  ;;  %702 = vadd.xlane.f32.xlu1 %v628_v7  ;;  %700 = vadd.xlane.f32.xlu0 %v627_v8  ;;  %v615_v16 = vmul.f32 %v599_v1, %v583_v4  ;;  %v669_v1 = vld [vmem:[#allocation2 + $0x18] sm:$0xff]  ;;  %v672_v7 = vld [vmem:[#allocation2 + $0x30] sm:$0xff]  ;;  %v671_v8 = vld [vmem:[#allocation2 + $0x28] sm:$0xff] }
  0xda   : > { %v562_v11 = vpop.permute.xlu1 %561  ;;  %v557_v14 = vpop.permute.xlu0 %556 }
  0xdb   : > { %v585_v17 = vmax.f32 %v562_v11, %v1745_v50  ;;  %v584_v19 = vmax.f32 %v557_v14, %v1745_v50  ;;  %v630_v20 = vmax.f32 %v1720_v43, %v614_v9  ;;  %v631_v36 = vmax.f32 %v1717_v42, %v615_v16  ;;  %v674_v14 = vld [vmem:[#allocation2 + $0x40] sm:$0xff] }
  0xdc   : > { %v636_v50 = vsub.f32 0.0, %v1649_v22  ;;  %v640_v22 = vsub.f32 0.0, %v1684_v31  ;;  %v644_v31 = vsub.f32 0.0, %v1708_v39  ;;  %v662_v53 = vmax.f32 %v646_v35, %v614_v9 }
  0xdd   : > { %v616_v21 = vmul.f32 %v600_v10, %v584_v19  ;;  %706 = vadd.xlane.f32.xlu1 %v630_v20  ;;  %704 = vadd.xlane.f32.xlu0 %v629_v15  ;;  %v617_v27 = vmul.f32 %v601_v13, %v585_v17  ;;  %v647_v39 = vsub.f32 0.0, %v1717_v42  ;;  %v673_v15 = vld [vmem:[#allocation2 + $0x38] sm:$0xff] }
  0xde   : > { %v652_v45 = vmax.f32 %v636_v50, %v1751_v57  ;;  %v656_v57 = vmax.f32 %v640_v22, %v1785_v26  ;;  %v660_v26 = vmax.f32 %v644_v31, %v1809_v61  ;;  %v668_v61 = vld [vmem:[#allocation2 + $0x10] sm:$0xff]  ;;  %v677_v50 = vld [vmem:[#allocation2 + $0x58] sm:$0xff] }
  0xdf   : > { %v632_v33 = vmax.f32 %v1732_v47, %v616_v21  ;;  %v633_v41 = vmax.f32 %v1729_v46, %v617_v27  ;;  %v664_v34 = vmax.f32 %v648_v32, %v616_v21  ;;  %v663_v54 = vmax.f32 %v647_v39, %v615_v16  ;;  %v676_v21 = vld [vmem:[#allocation2 + $0x50] sm:$0xff]  ;;  %v750_v32 = vld [vmem:[#allocation3 + $0x18] sm:$0xff] }
  0xe0   : > { %v665_v43 = vmax.f32 %v649_v56, %v617_v27  ;;  %v675_v27 = vld [vmem:[#allocation2 + $0x48] sm:$0xff] }
  0xe1   : > { %710 = vadd.xlane.f32.xlu1 %v632_v33  ;;  %708 = vadd.xlane.f32.xlu0 %v631_v36 }
  0xe5   : > { %763 = vadd.xlane.f32.xlu1 %v650_v40  ;;  %712 = vadd.xlane.f32.xlu0 %v633_v41  ;;  %v678_v41 = vld [vmem:[#allocation2 + $0x60] sm:$0xff] }
  0xe9   : > { %767 = vadd.xlane.f32.xlu1 %v652_v45  ;;  %765 = vadd.xlane.f32.xlu0 %v651_v49 }
  0xed   : > { %771 = vadd.xlane.f32.xlu1 %v654_v58  ;;  %769 = vadd.xlane.f32.xlu0 %v653_v52  ;;  %v679_v58 = vld [vmem:[#allocation2 + $0x68] sm:$0xff] }
  0xf1   : > { %775 = vadd.xlane.f32.xlu1 %v656_v57  ;;  %773 = vadd.xlane.f32.xlu0 %v655_v2  ;;  %v747_v2 = vld [vmem:[#allocation3] sm:$0xff] }
  0xf5   : > { %779 = vadd.xlane.f32.xlu1 %v658_v12  ;;  %777 = vadd.xlane.f32.xlu0 %v657_v5 }
  0xf9   : > { %783 = vadd.xlane.f32.xlu1 %v660_v26  ;;  %781 = vadd.xlane.f32.xlu0 %v659_v18  ;;  %v748_v26 = vld [vmem:[#allocation3 + $0x8] sm:$0xff] }
  0xfd   : > { %787 = vadd.xlane.f32.xlu1 %v662_v53  ;;  %785 = vadd.xlane.f32.xlu0 %v661_v48  ;;  %v751_v48 = vld [vmem:[#allocation3 + $0x20] sm:$0xff] }
 0x101   : > { %791 = vadd.xlane.f32.xlu1 %v664_v34  ;;  %789 = vadd.xlane.f32.xlu0 %v663_v54 }
 0x105   : > { %793 = vadd.xlane.f32.xlu0 %v665_v43  ;;  %v753_v43 = vld [vmem:[#allocation3 + $0x30] sm:$0xff] }
 0x14e   : > { %v683_v55 = vpop.xlane.xlu0 %682 }
 0x14f   : > { %v714_v59 = vadd.f32 %v683_v55, %v666_v38  ;;  %v752_v38 = vld [vmem:[#allocation3 + $0x28] sm:$0xff] }
 0x151   : > { %731 = vst.msk [vmem:[#allocation2] sm:$0xff] %vm730_vm1, %v714_v59 }
 0x152   : > { %v685_v47 = vpop.xlane.xlu1 %684  ;;  %v687_v42 = vpop.xlane.xlu0 %686 }
 0x153   : > { %v715_v62 = vadd.f32 %v685_v47, %v667_v60  ;;  %v716_v63 = vadd.f32 %v687_v42, %v668_v61  ;;  %v755_v47 = vld [vmem:[#allocation3 + $0x40] sm:$0xff]  ;;  %v754_v42 = vld [vmem:[#allocation3 + $0x38] sm:$0xff] }
 0x155   : > { %732 = vst.msk [vmem:[#allocation2 + $0x8] sm:$0xff] %vm730_vm1, %v715_v62  ;;  %733 = vst.msk [vmem:[#allocation2 + $0x10] sm:$0xff] %vm730_vm1, %v716_v63 }
 0x156   : > { %v691_v46 = vpop.xlane.xlu1 %690  ;;  %v689_v3 = vpop.xlane.xlu0 %688 }
 0x157   : > { %v718_v4 = vadd.f32 %v691_v46, %v670_v0  ;;  %v717_v6 = vadd.f32 %v689_v3, %v669_v1  ;;  %v757_v46 = vld [vmem:[#allocation3 + $0x50] sm:$0xff]  ;;  %v756_v3 = vld [vmem:[#allocation3 + $0x48] sm:$0xff] }
 0x159   : > { %735 = vst.msk [vmem:[#allocation2 + $0x20] sm:$0xff] %vm730_vm1, %v718_v4  ;;  %734 = vst.msk [vmem:[#allocation2 + $0x18] sm:$0xff] %vm730_vm1, %v717_v6 }
 0x15a   : > { %v695_v9 = vpop.xlane.xlu1 %694  ;;  %v693_v10 = vpop.xlane.xlu0 %692 }
 0x15b   : > { %v720_v11 = vadd.f32 %v695_v9, %v672_v7  ;;  %v719_v13 = vadd.f32 %v693_v10, %v671_v8  ;;  %v759_v9 = vld [vmem:[#allocation3 + $0x60] sm:$0xff]  ;;  %v758_v10 = vld [vmem:[#allocation3 + $0x58] sm:$0xff] }
 0x15d   : > { %737 = vst.msk [vmem:[#allocation2 + $0x30] sm:$0xff] %vm730_vm1, %v720_v11  ;;  %736 = vst.msk [vmem:[#allocation2 + $0x28] sm:$0xff] %vm730_vm1, %v719_v13 }
 0x15e   : > { %v699_v16 = vpop.xlane.xlu1 %698  ;;  %v697_v17 = vpop.xlane.xlu0 %696 }
 0x15f   : > { %v722_v19 = vadd.f32 %v699_v16, %v674_v14  ;;  %v721_v20 = vadd.f32 %v697_v17, %v673_v15  ;;  %v761_v16 = vld [vmem:[#allocation3 + $0x70] sm:$0xff]  ;;  %v760_v17 = vld [vmem:[#allocation3 + $0x68] sm:$0xff] }
 0x161   : > { %739 = vst.msk [vmem:[#allocation2 + $0x40] sm:$0xff] %vm730_vm1, %v722_v19  ;;  %738 = vst.msk [vmem:[#allocation2 + $0x38] sm:$0xff] %vm730_vm1, %v721_v20 }
 0x162   : > { %v703_v33 = vpop.xlane.xlu1 %702  ;;  %v701_v36 = vpop.xlane.xlu0 %700 }
 0x163   : > { %v724_v37 = vadd.f32 %v703_v33, %v676_v21  ;;  %v723_v40 = vadd.f32 %v701_v36, %v675_v27  ;;  %v762_v33 = vld [vmem:[#allocation3 + $0x78] sm:$0xff] }
 0x165   : > { %741 = vst.msk [vmem:[#allocation2 + $0x50] sm:$0xff] %vm730_vm1, %v724_v37  ;;  %740 = vst.msk [vmem:[#allocation2 + $0x48] sm:$0xff] %vm730_vm1, %v723_v40 }
 0x166   : > { %v707_v44 = vpop.xlane.xlu1 %706  ;;  %v705_v45 = vpop.xlane.xlu0 %704 }
 0x167   : > { %v726_v49 = vadd.f32 %v707_v44, %v678_v41  ;;  %v725_v51 = vadd.f32 %v705_v45, %v677_v50 }
 0x169   : > { %743 = vst.msk [vmem:[#allocation2 + $0x60] sm:$0xff] %vm730_vm1, %v726_v49  ;;  %742 = vst.msk [vmem:[#allocation2 + $0x58] sm:$0xff] %vm730_vm1, %v725_v51 }
 0x16a   : > { %v711_v52 = vpop.xlane.xlu1 %710  ;;  %v709_v22 = vpop.xlane.xlu0 %708 }
 0x16b   : > { %v728_v25 = vadd.f32 %v711_v52, %v680_v23  ;;  %v727_v57 = vadd.f32 %v709_v22, %v679_v58 }
 0x16d   : > { %745 = vst.msk [vmem:[#allocation2 + $0x70] sm:$0xff] %vm730_vm1, %v728_v25  ;;  %744 = vst.msk [vmem:[#allocation2 + $0x68] sm:$0xff] %vm730_vm1, %v727_v57 }
 0x16e   : > { %v764_v24 = vpop.xlane.xlu1 %763  ;;  %v713_v12 = vpop.xlane.xlu0 %712 }
 0x16f   : > { %v795_v5 = vadd.f32 %v764_v24, %v747_v2  ;;  %v729_v31 = vadd.f32 %v713_v12, %v681_v29 }
 0x171   : > { %811 = vst.msk [vmem:[#allocation3] sm:$0xff] %vm730_vm1, %v795_v5  ;;  %746 = vst.msk [vmem:[#allocation2 + $0x78] sm:$0xff] %vm730_vm1, %v729_v31 }
 0x172   : > { %v768_v18 = vpop.xlane.xlu1 %767  ;;  %v766_v35 = vpop.xlane.xlu0 %765 }
 0x173   : > { %v797_v30 = vadd.f32 %v768_v18, %v749_v28  ;;  %v796_v53 = vadd.f32 %v766_v35, %v748_v26 }
 0x175   : > { %813 = vst.msk [vmem:[#allocation3 + $0x10] sm:$0xff] %vm730_vm1, %v797_v30  ;;  %812 = vst.msk [vmem:[#allocation3 + $0x8] sm:$0xff] %vm730_vm1, %v796_v53 }
 0x176   : > { %v772_v39 = vpop.xlane.xlu1 %771  ;;  %v770_v34 = vpop.xlane.xlu0 %769 }
 0x177   : > { %v799_v54 = vadd.f32 %v772_v39, %v751_v48  ;;  %v798_v56 = vadd.f32 %v770_v34, %v750_v32 }
 0x179   : > { %815 = vst.msk [vmem:[#allocation3 + $0x20] sm:$0xff] %vm730_vm1, %v799_v54  ;;  %814 = vst.msk [vmem:[#allocation3 + $0x18] sm:$0xff] %vm730_vm1, %v798_v56 }
 0x17a   : > { %v776_v55 = vpop.xlane.xlu1 %775  ;;  %v774_v59 = vpop.xlane.xlu0 %773 }
 0x17b   : > { %v801_v60 = vadd.f32 %v776_v55, %v753_v43  ;;  %v800_v61 = vadd.f32 %v774_v59, %v752_v38 }
 0x17d   : > { %817 = vst.msk [vmem:[#allocation3 + $0x30] sm:$0xff] %vm730_vm1, %v801_v60  ;;  %816 = vst.msk [vmem:[#allocation3 + $0x28] sm:$0xff] %vm730_vm1, %v800_v61 }
 0x17e   : > { %v780_v62 = vpop.xlane.xlu1 %779  ;;  %v778_v63 = vpop.xlane.xlu0 %777 }
 0x17f   : > { %v803_v0 = vadd.f32 %v780_v62, %v755_v47  ;;  %v802_v1 = vadd.f32 %v778_v63, %v754_v42 }
 0x181   : > { %819 = vst.msk [vmem:[#allocation3 + $0x40] sm:$0xff] %vm730_vm1, %v803_v0  ;;  %818 = vst.msk [vmem:[#allocation3 + $0x38] sm:$0xff] %vm730_vm1, %v802_v1 }
 0x182   : > { %v784_v4 = vpop.xlane.xlu1 %783  ;;  %v782_v6 = vpop.xlane.xlu0 %781 }
 0x183   : > { %v805_v7 = vadd.f32 %v784_v4, %v757_v46  ;;  %v804_v8 = vadd.f32 %v782_v6, %v756_v3 }
 0x185   : > { %821 = vst.msk [vmem:[#allocation3 + $0x50] sm:$0xff] %vm730_vm1, %v805_v7  ;;  %820 = vst.msk [vmem:[#allocation3 + $0x48] sm:$0xff] %vm730_vm1, %v804_v8 }
 0x186   : > { %v788_v11 = vpop.xlane.xlu1 %787  ;;  %v786_v13 = vpop.xlane.xlu0 %785 }
 0x187   : > { %v807_v14 = vadd.f32 %v788_v11, %v759_v9  ;;  %v806_v15 = vadd.f32 %v786_v13, %v758_v10 }
 0x189   : > { %823 = vst.msk [vmem:[#allocation3 + $0x60] sm:$0xff] %vm730_vm1, %v807_v14  ;;  %822 = vst.msk [vmem:[#allocation3 + $0x58] sm:$0xff] %vm730_vm1, %v806_v15 }
 0x18a   : > { %v792_v19 = vpop.xlane.xlu1 %791  ;;  %v790_v20 = vpop.xlane.xlu0 %789 }
 0x18b   : > { %v809_v21 = vadd.f32 %v792_v19, %v761_v16  ;;  %v808_v27 = vadd.f32 %v790_v20, %v760_v17 }
 0x18d   : > { %825 = vst.msk [vmem:[#allocation3 + $0x70] sm:$0xff] %vm730_vm1, %v809_v21  ;;  %824 = vst.msk [vmem:[#allocation3 + $0x68] sm:$0xff] %vm730_vm1, %v808_v27  ;;  %830 = sbr.rel (%p1276_p1) target bundleno = 450 (0x1c2), region = 78 }
 0x18e   : > { %v794_v36 = vpop.xlane.xlu0 %793 }
 0x18f   : > { %v810_v37 = vadd.f32 %v794_v36, %v762_v33 }
 0x191   : > { %826 = vst.msk [vmem:[#allocation3 + $0x78] sm:$0xff] %vm730_vm1, %v810_v37 }
 0x192   : > { %v831_v40 = vld [vmem:[#allocation2] sm:$0xff]  ;;  %v832_v41 = vld [vmem:[#allocation2 + $0x8] sm:$0xff]  ;;  %v833_v50 = vld [vmem:[#allocation2 + $0x10] sm:$0xff] }
 0x193   : > { %1345 = vrsqrt.f32 %v831_v40  ;;  %v834_v44 = vld [vmem:[#allocation2 + $0x18] sm:$0xff]  ;;  %v835_v45 = vld [vmem:[#allocation2 + $0x20] sm:$0xff]  ;;  %v836_v49 = vld [vmem:[#allocation2 + $0x28] sm:$0xff]  ;;  %vm863_vm2 = vcmp.gt.f32.partialorder %v831_v40, 0.0  ;;  %vm864_vm3 = vcmp.gt.f32.partialorder %v832_v41, 0.0  ;;  %vm865_vm4 = vcmp.gt.f32.partialorder %v833_v50, 0.0 }
 0x194   : > { %1347 = vrsqrt.f32 %v832_v41  ;;  %v1892_v51 = vld [vmem:[#allocation2 + $0x30] sm:$0xff]  ;;  %v1894_v23 = vld [vmem:[#allocation2 + $0x38] sm:$0xff]  ;;  %v1896_v58 = vld [vmem:[#allocation2 + $0x40] sm:$0xff]  ;;  %vm866_vm5 = vcmp.gt.f32.partialorder %v834_v44, 0.0  ;;  %vm867_vm6 = vcmp.gt.f32.partialorder %v835_v45, 0.0  ;;  %vm868_vm7 = vcmp.gt.f32.partialorder %v836_v49, 0.0 }
 0x195   : > { %1349 = vrsqrt.f32 %v833_v50  ;;  %v1899_v52 = vld [vmem:[#allocation2 + $0x48] sm:$0xff]  ;;  %v1902_v22 = vld [vmem:[#allocation2 + $0x50] sm:$0xff]  ;;  %v1905_v25 = vld [vmem:[#allocation2 + $0x58] sm:$0xff]  ;;  %vm869_vm8 = vcmp.gt.f32.partialorder %v1892_v51, 0.0  ;;  %vm870_vm9 = vcmp.gt.f32.partialorder %v1894_v23, 0.0  ;;  %vm871_vm10 = vcmp.gt.f32.partialorder %v1896_v58, 0.0 }
 0x196   : > { %1351 = vrsqrt.f32 %v834_v44  ;;  %v1908_v57 = vld [vmem:[#allocation2 + $0x60] sm:$0xff]  ;;  %v1911_v2 = vld [vmem:[#allocation2 + $0x68] sm:$0xff]  ;;  %v1914_v29 = vld [vmem:[#allocation2 + $0x70] sm:$0xff]  ;;  %vm872_vm11 = vcmp.gt.f32.partialorder %v1899_v52, 0.0  ;;  %vm873_vm12 = vcmp.gt.f32.partialorder %v1902_v22, 0.0  ;;  %vm874_vm13 = vcmp.gt.f32.partialorder %v1905_v25, 0.0 }
 0x197   : > { %1353 = vrsqrt.f32 %v835_v45  ;;  %v1917_v24 = vld [vmem:[#allocation2 + $0x78] sm:$0xff]  ;;  %v1920_v5 = vld [vmem:[#allocation3] sm:$0xff]  ;;  %v1923_v26 = vld [vmem:[#allocation3 + $0x8] sm:$0xff]  ;;  %vm875_vm14 = vcmp.gt.f32.partialorder %v1908_v57, 0.0  ;;  %vm876_vm15 = vcmp.gt.f32.partialorder %v1911_v2, 0.0  ;;  %vm877_vm0 = vcmp.gt.f32.partialorder %v1914_v29, 0.0 }
 0x198   : > { %1355 = vrsqrt.f32 %v836_v49  ;;  %v1928_v30 = vld [vmem:[#allocation3 + $0x10] sm:$0xff]  ;;  %v1934_v32 = vld [vmem:[#allocation3 + $0x18] sm:$0xff]  ;;  %v1941_v54 = vld [vmem:[#allocation3 + $0x20] sm:$0xff] }
 0x199   : > { %1357 = vrsqrt.f32 %v1892_v51  ;;  %v1948_v38 = vld [vmem:[#allocation3 + $0x28] sm:$0xff]  ;;  %v1955_v60 = vld [vmem:[#allocation3 + $0x30] sm:$0xff]  ;;  %v1963_v42 = vld [vmem:[#allocation3 + $0x38] sm:$0xff] }
 0x19a   : > { %1359 = vrsqrt.f32 %v1894_v23  ;;  %v1971_v0 = vld [vmem:[#allocation3 + $0x40] sm:$0xff]  ;;  %v1979_v3 = vld [vmem:[#allocation3 + $0x48] sm:$0xff]  ;;  %v1987_v7 = vld [vmem:[#allocation3 + $0x50] sm:$0xff] }
 0x19b   : > { %1361 = vrsqrt.f32 %v1896_v58  ;;  %v1995_v10 = vld [vmem:[#allocation3 + $0x58] sm:$0xff]  ;;  %v2003_v14 = vld [vmem:[#allocation3 + $0x60] sm:$0xff]  ;;  %v2011_v17 = vld [vmem:[#allocation3 + $0x68] sm:$0xff] }
 0x19c   : > { %1363 = vrsqrt.f32 %v1899_v52  ;;  %v2019_v21 = vld [vmem:[#allocation3 + $0x70] sm:$0xff]  ;;  %v2027_v36 = vld [vmem:[#allocation3 + $0x78] sm:$0xff] }
 0x19d   : > { %1365 = vrsqrt.f32 %v1902_v22 }
 0x19e   : > { %1367 = vrsqrt.f32 %v1905_v25 }
 0x19f   : > { %1369 = vrsqrt.f32 %v1908_v57 }
 0x1a0   : > { %v1346_v12 = vpop.eup %1345  ;;  %1371 = vrsqrt.f32 %v1911_v2 }
 0x1a1   : > { %v1348_v31 = vpop.eup %1347  ;;  %v895_v28 = vsel %vm863_vm2, %v1346_v12, 0.0  ;;  %1373 = vrsqrt.f32 %v1914_v29  ;;  %vm878_vm2 = vcmp.gt.f32.partialorder %v1917_v24, 0.0 }
 0x1a2   : > { %v1350_v18 = vpop.eup %1349  ;;  %911 = vst.msk [vmem:[%s1593_s13] sm:$0xff] %vm730_vm1, %v895_v28  ;;  %v896_v35 = vsel %vm864_vm3, %v1348_v31, 0.0  ;;  %1375 = vrsqrt.f32 %v1917_v24  ;;  %vm927_vm3 = vcmp.gt.f32.partialorder %v1920_v5, 0.0 }
 0x1a3   : > { %v1352_v53 = vpop.eup %1351  ;;  %912 = vst.msk [vmem:[%s1593_s13 + $0x8] sm:$0xff] %vm730_vm1, %v896_v35  ;;  %v897_v48 = vsel %vm865_vm4, %v1350_v18, 0.0  ;;  %1377 = vrsqrt.f32 %v1920_v5  ;;  %vm928_vm4 = vcmp.gt.f32.partialorder %v1923_v26, 0.0 }
 0x1a4   : > { %v1354_v39 = vpop.eup %1353  ;;  %913 = vst.msk [vmem:[%s1593_s13 + $0x10] sm:$0xff] %vm730_vm1, %v897_v48  ;;  %v898_v34 = vsel %vm866_vm5, %v1352_v53, 0.0  ;;  %1379 = vrsqrt.f32 %v1923_v26  ;;  %vm929_vm5 = vcmp.gt.f32.partialorder %v1928_v30, 0.0 }
 0x1a5   : > { %v1356_v56 = vpop.eup %1355  ;;  %914 = vst.msk [vmem:[%s1593_s13 + $0x18] sm:$0xff] %vm730_vm1, %v898_v34  ;;  %v899_v43 = vsel %vm867_vm6, %v1354_v39, 0.0  ;;  %1381 = vrsqrt.f32 %v1928_v30  ;;  %vm930_vm6 = vcmp.gt.f32.partialorder %v1934_v32, 0.0 }
 0x1a6   : > { %v1358_v55 = vpop.eup %1357  ;;  %915 = vst.msk [vmem:[%s1593_s13 + $0x20] sm:$0xff] %vm730_vm1, %v899_v43  ;;  %v900_v59 = vsel %vm868_vm7, %v1356_v56, 0.0  ;;  %1383 = vrsqrt.f32 %v1934_v32  ;;  %vm931_vm7 = vcmp.gt.f32.partialorder %v1941_v54, 0.0 }
 0x1a7   : > { %v1360_v61 = vpop.eup %1359  ;;  %916 = vst.msk [vmem:[%s1593_s13 + $0x28] sm:$0xff] %vm730_vm1, %v900_v59  ;;  %v901_v47 = vsel %vm869_vm8, %v1358_v55, 0.0  ;;  %1385 = vrsqrt.f32 %v1941_v54  ;;  %vm932_vm8 = vcmp.gt.f32.partialorder %v1948_v38, 0.0 }
 0x1a8   : > { %v1362_v62 = vpop.eup %1361  ;;  %917 = vst.msk [vmem:[%s1593_s13 + $0x30] sm:$0xff] %vm730_vm1, %v901_v47  ;;  %v902_v63 = vsel %vm870_vm9, %v1360_v61, 0.0  ;;  %1387 = vrsqrt.f32 %v1948_v38  ;;  %vm933_vm9 = vcmp.gt.f32.partialorder %v1955_v60, 0.0 }
 0x1a9   : > { %v1364_v1 = vpop.eup %1363  ;;  %918 = vst.msk [vmem:[%s1593_s13 + $0x38] sm:$0xff] %vm730_vm1, %v902_v63  ;;  %v903_v46 = vsel %vm871_vm10, %v1362_v62, 0.0  ;;  %1389 = vrsqrt.f32 %v1955_v60  ;;  %vm934_vm10 = vcmp.gt.f32.partialorder %v1963_v42, 0.0 }
 0x1aa   : > { %v1366_v4 = vpop.eup %1365  ;;  %919 = vst.msk [vmem:[%s1593_s13 + $0x40] sm:$0xff] %vm730_vm1, %v903_v46  ;;  %v904_v6 = vsel %vm872_vm11, %v1364_v1, 0.0  ;;  %1391 = vrsqrt.f32 %v1963_v42  ;;  %vm935_vm11 = vcmp.gt.f32.partialorder %v1971_v0, 0.0 }
 0x1ab   : > { %v1368_v8 = vpop.eup %1367  ;;  %920 = vst.msk [vmem:[%s1593_s13 + $0x48] sm:$0xff] %vm730_vm1, %v904_v6  ;;  %v905_v9 = vsel %vm873_vm12, %v1366_v4, 0.0  ;;  %1393 = vrsqrt.f32 %v1971_v0  ;;  %vm936_vm12 = vcmp.gt.f32.partialorder %v1979_v3, 0.0 }
 0x1ac   : > { %v1370_v11 = vpop.eup %1369  ;;  %921 = vst.msk [vmem:[%s1593_s13 + $0x50] sm:$0xff] %vm730_vm1, %v905_v9  ;;  %v906_v13 = vsel %vm874_vm13, %v1368_v8, 0.0  ;;  %1395 = vrsqrt.f32 %v1979_v3  ;;  %vm937_vm13 = vcmp.gt.f32.partialorder %v1987_v7, 0.0 }
 0x1ad   : > { %v1372_v15 = vpop.eup %1371  ;;  %922 = vst.msk [vmem:[%s1593_s13 + $0x58] sm:$0xff] %vm730_vm1, %v906_v13  ;;  %v907_v16 = vsel %vm875_vm14, %v1370_v11, 0.0  ;;  %1397 = vrsqrt.f32 %v1987_v7  ;;  %vm938_vm14 = vcmp.gt.f32.partialorder %v1995_v10, 0.0 }
 0x1ae   : > { %v1374_v19 = vpop.eup %1373  ;;  %923 = vst.msk [vmem:[%s1593_s13 + $0x60] sm:$0xff] %vm730_vm1, %v907_v16  ;;  %v908_v20 = vsel %vm876_vm15, %v1372_v15, 0.0  ;;  %1399 = vrsqrt.f32 %v1995_v10  ;;  %vm939_vm15 = vcmp.gt.f32.partialorder %v2003_v14, 0.0 }
 0x1af   : > { %v1376_v27 = vpop.eup %1375  ;;  %924 = vst.msk [vmem:[%s1593_s13 + $0x68] sm:$0xff] %vm730_vm1, %v908_v20  ;;  %v909_v33 = vsel %vm877_vm0, %v1374_v19, 0.0  ;;  %1401 = vrsqrt.f32 %v2003_v14  ;;  %vm940_vm0 = vcmp.gt.f32.partialorder %v2011_v17, 0.0 }
 0x1b0   : > { %v1378_v37 = vpop.eup %1377  ;;  %925 = vst.msk [vmem:[%s1593_s13 + $0x70] sm:$0xff] %vm730_vm1, %v909_v33  ;;  %v910_v40 = vsel %vm878_vm2, %v1376_v27, 0.0  ;;  %1403 = vrsqrt.f32 %v2011_v17  ;;  %vm941_vm2 = vcmp.gt.f32.partialorder %v2019_v21, 0.0 }
 0x1b1   : > { %v1380_v41 = vpop.eup %1379  ;;  %926 = vst.msk [vmem:[%s1593_s13 + $0x78] sm:$0xff] %vm730_vm1, %v910_v40  ;;  %v959_v50 = vsel %vm927_vm3, %v1378_v37, 0.0  ;;  %1405 = vrsqrt.f32 %v2019_v21  ;;  %vm942_vm3 = vcmp.gt.f32.partialorder %v2027_v36, 0.0 }
 0x1b2   : > { %v1382_v44 = vpop.eup %1381  ;;  %975 = vst.msk [vmem:[%s1601_s16] sm:$0xff] %vm730_vm1, %v959_v50  ;;  %v960_v45 = vsel %vm928_vm4, %v1380_v41, 0.0  ;;  %1407 = vrsqrt.f32 %v2027_v36 }
 0x1b3   : > { %v1384_v49 = vpop.eup %1383  ;;  %976 = vst.msk [vmem:[%s1601_s16 + $0x8] sm:$0xff] %vm730_vm1, %v960_v45  ;;  %v961_v51 = vsel %vm929_vm5, %v1382_v44, 0.0 }
 0x1b4   : > { %v1386_v23 = vpop.eup %1385  ;;  %977 = vst.msk [vmem:[%s1601_s16 + $0x10] sm:$0xff] %vm730_vm1, %v961_v51  ;;  %v962_v58 = vsel %vm930_vm6, %v1384_v49, 0.0 }
 0x1b5   : > { %v1388_v52 = vpop.eup %1387  ;;  %978 = vst.msk [vmem:[%s1601_s16 + $0x18] sm:$0xff] %vm730_vm1, %v962_v58  ;;  %v963_v22 = vsel %vm931_vm7, %v1386_v23, 0.0 }
 0x1b6   : > { %v1390_v25 = vpop.eup %1389  ;;  %979 = vst.msk [vmem:[%s1601_s16 + $0x20] sm:$0xff] %vm730_vm1, %v963_v22  ;;  %v964_v57 = vsel %vm932_vm8, %v1388_v52, 0.0 }
 0x1b7   : > { %v1392_v2 = vpop.eup %1391  ;;  %980 = vst.msk [vmem:[%s1601_s16 + $0x28] sm:$0xff] %vm730_vm1, %v964_v57  ;;  %v965_v29 = vsel %vm933_vm9, %v1390_v25, 0.0 }
 0x1b8   : > { %v1394_v24 = vpop.eup %1393  ;;  %981 = vst.msk [vmem:[%s1601_s16 + $0x30] sm:$0xff] %vm730_vm1, %v965_v29  ;;  %v966_v12 = vsel %vm934_vm10, %v1392_v2, 0.0 }
 0x1b9   : > { %v1396_v5 = vpop.eup %1395  ;;  %982 = vst.msk [vmem:[%s1601_s16 + $0x38] sm:$0xff] %vm730_vm1, %v966_v12  ;;  %v967_v31 = vsel %vm935_vm11, %v1394_v24, 0.0 }
 0x1ba   : > { %v1398_v28 = vpop.eup %1397  ;;  %983 = vst.msk [vmem:[%s1601_s16 + $0x40] sm:$0xff] %vm730_vm1, %v967_v31  ;;  %v968_v26 = vsel %vm936_vm12, %v1396_v5, 0.0 }
 0x1bb   : > { %v1400_v18 = vpop.eup %1399  ;;  %984 = vst.msk [vmem:[%s1601_s16 + $0x48] sm:$0xff] %vm730_vm1, %v968_v26  ;;  %v969_v35 = vsel %vm937_vm13, %v1398_v28, 0.0 }
 0x1bc   : > { %v1402_v30 = vpop.eup %1401  ;;  %985 = vst.msk [vmem:[%s1601_s16 + $0x50] sm:$0xff] %vm730_vm1, %v969_v35  ;;  %v970_v53 = vsel %vm938_vm14, %v1400_v18, 0.0 }
 0x1bd   : > { %v1404_v48 = vpop.eup %1403  ;;  %986 = vst.msk [vmem:[%s1601_s16 + $0x58] sm:$0xff] %vm730_vm1, %v970_v53  ;;  %v971_v32 = vsel %vm939_vm15, %v1402_v30, 0.0 }
 0x1be   : > { %v1406_v39 = vpop.eup %1405  ;;  %987 = vst.msk [vmem:[%s1601_s16 + $0x60] sm:$0xff] %vm730_vm1, %v971_v32  ;;  %v972_v34 = vsel %vm940_vm0, %v1404_v48, 0.0 }
 0x1bf   : > { %v1408_v54 = vpop.eup %1407  ;;  %988 = vst.msk [vmem:[%s1601_s16 + $0x68] sm:$0xff] %vm730_vm1, %v972_v34  ;;  %v973_v56 = vsel %vm941_vm2, %v1406_v39, 0.0 }
 0x1c0   : > { %989 = vst.msk [vmem:[%s1601_s16 + $0x70] sm:$0xff] %vm730_vm1, %v973_v56  ;;  %v974_v43 = vsel %vm942_vm3, %v1408_v54, 0.0 }
 0x1c1   : > { %990 = vst.msk [vmem:[%s1601_s16 + $0x78] sm:$0xff] %vm730_vm1, %v974_v43 }
 0x1c2 PF: > { %1015 = sbr.rel (!%p1545_p6) target bundleno = 462 (0x1ce), region = 90  ;;  %s1284_s10 = sshll.u32 (%p1545_p6), %s1451_s21, 5  ;;  %v1079_v38 = vld [vmem:[%s1609_s9] sm:$0xff] (%p1545_p6)  ;;  %v1081_v55 = vld [vmem:[%s1609_s9 + $0x8] sm:$0xff] (%p1545_p6)  ;;  %v1083_v59 = vld [vmem:[%s1609_s9 + $0x10] sm:$0xff] (%p1545_p6) }
 0x1c3   : > { %s1018_s29 = sadd.s32 (%p1545_p6), %s1447_s20, %s1284_s10  ;;  %v1085_v60 = vld [vmem:[%s1609_s9 + $0x18] sm:$0xff] (%p1545_p6)  ;;  %v1087_v61 = vld [vmem:[%s1609_s9 + $0x20] sm:$0xff] (%p1545_p6)  ;;  %v1089_v47 = vld [vmem:[%s1609_s9 + $0x28] sm:$0xff] (%p1545_p6) }
 0x1c4   : > { %s1280_s11 = sshll.u32 (%p1545_p6), %s1018_s29, 3  ;;  %v1091_v42 = vld [vmem:[%s1609_s9 + $0x30] sm:$0xff] (%p1545_p6)  ;;  %v1093_v62 = vld [vmem:[%s1609_s9 + $0x38] sm:$0xff] (%p1545_p6)  ;;  %v1095_v63 = vld [vmem:[%s1609_s9 + $0x40] sm:$0xff] (%p1545_p6) }
 0x1c5   : > { %s1020_s14 = scalar_lea.vmem (%p1545_p6), %s2135_s5, %s1280_s11  ;;  %v1097_v0 = vld [vmem:[%s1609_s9 + $0x48] sm:$0xff] (%p1545_p6)  ;;  %v1099_v1 = vld [vmem:[%s1609_s9 + $0x50] sm:$0xff] (%p1545_p6)  ;;  %v1101_v46 = vld [vmem:[%s1609_s9 + $0x58] sm:$0xff] (%p1545_p6) }
 0x1c6   : > { %1080 = vst [vmem:[%s1020_s14] sm:$0xff] (%p1545_p6), %v1079_v38  ;;  %1082 = vst [vmem:[%s1020_s14 + $0x10] sm:$0xff] (%p1545_p6), %v1081_v55  ;;  %v1103_v3 = vld [vmem:[%s1609_s9 + $0x60] sm:$0xff] (%p1545_p6)  ;;  %v1105_v4 = vld [vmem:[%s1609_s9 + $0x68] sm:$0xff] (%p1545_p6) }
 0x1c7   : > { %1084 = vst [vmem:[%s1020_s14 + $0x20] sm:$0xff] %v1083_v59  ;;  %1086 = vst [vmem:[%s1020_s14 + $0x30] sm:$0xff] %v1085_v60  ;;  %v1107_v6 = vld [vmem:[%s1609_s9 + $0x70] sm:$0xff]  ;;  %v1109_v7 = vld [vmem:[%s1609_s9 + $0x78] sm:$0xff] }
 0x1c8   : > { %1088 = vst [vmem:[%s1020_s14 + $0x40] sm:$0xff] %v1087_v61  ;;  %1090 = vst [vmem:[%s1020_s14 + $0x50] sm:$0xff] %v1089_v47 }
 0x1c9   : > { %1092 = vst [vmem:[%s1020_s14 + $0x60] sm:$0xff] %v1091_v42  ;;  %1094 = vst [vmem:[%s1020_s14 + $0x70] sm:$0xff] %v1093_v62 }
 0x1ca   : > { %1096 = vst [vmem:[%s1020_s14 + $0x80] sm:$0xff] %v1095_v63  ;;  %1098 = vst [vmem:[%s1020_s14 + $0x90] sm:$0xff] %v1097_v0 }
 0x1cb   : > { %1100 = vst [vmem:[%s1020_s14 + $0xa0] sm:$0xff] %v1099_v1  ;;  %1102 = vst [vmem:[%s1020_s14 + $0xb0] sm:$0xff] %v1101_v46 }
 0x1cc   : > { %1104 = vst [vmem:[%s1020_s14 + $0xc0] sm:$0xff] %v1103_v3  ;;  %1106 = vst [vmem:[%s1020_s14 + $0xd0] sm:$0xff] %v1105_v4 }
 0x1cd   : > { %1108 = vst [vmem:[%s1020_s14 + $0xe0] sm:$0xff] %v1107_v6  ;;  %1110 = vst [vmem:[%s1020_s14 + $0xf0] sm:$0xff] %v1109_v7 }
 0x1ce PF: > { %s16_s24 = sadd.s32 1, %s1463_s24   ;;  %s2137_s18 = smov %s1443_s19 }
 0x1cf   : > { %p13_p2 = scmp.ge.s32.totalorder %s16_s24, 6   ;;  %s2138_s19 = smov %s1553_s8 }
 0x1d0   : > { %s2139_s20 = smov %s1455_s22  ;;  %s2140_s21 = smov %s1459_s23 }
 0x1d1   : > { %s2141_s22 = smov %s2144_s25  ;;  %s2142_s23 = smov %s2148_s26 }
 0x1d2   :  { %15 = sbr.rel (!%p13_p2) target bundleno = 4 (0x4), region = 181 }

// kernel: dir_edge_conv_forward.3
= control target key start
LH: loop header
LB: loop body
LE: loop exit
PB: predicated region body
PF: predicated region fallthrough
CT: control target
= control target key end

     0   :  { %s2392_s0 = inlined_call_operand.vmem [shape: f32[256,256], index: 0, kind: input, shape index: {}]   ;;  %s2393_s1 = inlined_call_operand.vmem [shape: f32[256,1], index: 1, kind: input, shape index: {}]   ;;  %s2394_s2 = inlined_call_operand.vmem [shape: f32[1,256], index: 2, kind: input, shape index: {}]   ;;  %s2395_s3 = inlined_call_operand.vmem [shape: f32[256,128], index: 3, kind: input, shape index: {}]   ;;  %s2396_s4 = inlined_call_operand.vmem [shape: f32[256,128], index: 4, kind: input, shape index: {}]   ;;  %s2397_s5 = inlined_call_operand.vmem [shape: f32[256,1], index: 5, kind: input, shape index: {}]   ;;  %s2398_s6 = inlined_call_operand.vmem [shape: f32[256,1], index: 6, kind: input, shape index: {}]   ;;  %s2399_s7 = inlined_call_operand.vmem [shape: f32[256,128], index: 7, kind: input, shape index: {}]   ;;  %s2400_s8 = inlined_call_operand.vmem [shape: f32[256,128], index: 8, kind: output, shape index: {}]  }
   0x1   :  { %2403 = sst [smem:[#allocation7_spill]] %s2392_s0 }
   0x2   :  { %2404 = sst [smem:[#allocation8_spill]] %s2393_s1 }
   0x3   :  { %s2025_s27 = smov 0   ;;  %s2027_s28 = smov 0  }
   0x4   :  { %s2029_s29 = smov 0   ;;  %s2031_s30 = smov 0  }
   0x5   :  { %s2033_s9 = smov 0   ;;  %s2035_s10 = smov 0  }
   0x6   :  { %s2037_s11 = smov 0  }
   0x7 LB: > { %s27_s12 = sadd.s32 1, %s1967_s9  ;;  %s30_s13 = sadd.s32 1, %s1971_s10  ;;  %s1975_s11 = sphi %s2037_s11, %s18_s11   ;;  %s1971_s10 = sphi %s2035_s10, %s2416_s10   ;;  %s1967_s9 = sphi %s2033_s9, %s2415_s9   ;;  %s1963_s30 = sphi %s2031_s30, %s2414_s30   ;;  %s1959_s29 = sphi %s2029_s29, %s2413_s29   ;;  %s1955_s28 = sphi %s2027_s28, %s2412_s28   ;;  %s1951_s27 = sphi %s2025_s27, %s2411_s27  }
   0x8   : > { %p28_p0 = scmp.ge.s32.totalorder %s27_s12, 2  ;;  %p46_p1 = scmp.ne.s32.totalorder %s1955_s28, %s1951_s27 }
   0x9   : > { %p47_p2 = scmp.eq.s32.totalorder %s1975_s11, 0  ;;  %s39_s17 = sadd.s32 1, %s1955_s28 }
   0xa   : > { %s2418_s12 = smov (%p28_p0, %s27_s12), 0  ;;  %s2420_s13 = smov (!%p28_p0, %s30_s13), %s1971_s10 }
   0xb   : > { %2405 = sst [smem:[#allocation5_spill]] %s2418_s12  ;;  %p48_p3 = por %p47_p2, %p46_p1 }
   0xc   : > { %p32_p4 = scmp.ge.s32.totalorder %s2420_s13, 2  ;;  %s35_s14 = ssub.s32 %s1967_s9, %s2418_s12 }
   0xd   : > { %p1658_p6 = scmp.ge.s32.totalorder %s1975_s11, 4 }
   0xe   : > { %s2422_s13 = smov (%p32_p4, %s2420_s13), 0 }
   0xf   : > { %2406 = sst [smem:[#allocation6_spill]] %s2422_s13  ;;  %s34_s15 = ssub.s32 %s1971_s10, %s2422_s13 }
  0x10   : > { %s36_s16 = sor.u32 %s35_s14, %s34_s15  ;;  %276 = sbr.rel (%p1658_p6) target bundleno = 39 (0x27), region = 24 }
  0x11   : > { %p37_p5 = scmp.eq.s32.totalorder %s36_s16, 0 }
  0x13   : > { %s2076_s18 = scalar_select %p37_p5, %s1955_s28, %s39_s17  }
  0x15   : > { %279 = sbr.rel (!%p48_p3) target bundleno = 39 (0x27), region = 28  ;;  %s281_s19 = sand.u32 (%p48_p3), 1, %s1955_s28  }
  0x16   : > { %s1681_s20 = sshll.u32 (%p48_p3), %s1971_s10, 5  ;;  %s1659_s21 = sshll.u32 (%p48_p3), %s281_s19, 7 }
  0x17   : > { %s286_s22 = sadd.s32 (%p48_p3), %s1967_s9, %s1681_s20  ;;  %s2407_s0 = sld [smem:[#allocation7_spill]] (%p48_p3) }
  0x18   : > { %s1662_s23 = sshll.u32 (%p48_p3), %s286_s22, 3  ;;  %s283_s14 = scalar_lea.vmem (%p48_p3), [#allocation4], %s1659_s21 }
  0x1d   : > { %s2085_s26 = scalar_lea.vmem %s2407_s0, %s1662_s23 }
  0x1e   : > { %v347_v0 = vld [vmem:[%s2085_s26] sm:$0xff]  ;;  %v349_v1 = vld [vmem:[%s2085_s26 + $0x10] sm:$0xff] }
  0x1f   : > { %v351_v2 = vld [vmem:[%s2085_s26 + $0x20] sm:$0xff]  ;;  %348 = vst [vmem:[%s283_s14] sm:$0xff] %v347_v0  ;;  %350 = vst [vmem:[%s283_s14 + $0x8] sm:$0xff] %v349_v1  ;;  %v353_v3 = vld [vmem:[%s2085_s26 + $0x30] sm:$0xff] }
  0x20   : > { %352 = vst [vmem:[%s283_s14 + $0x10] sm:$0xff] %v351_v2  ;;  %v355_v4 = vld [vmem:[%s2085_s26 + $0x40] sm:$0xff]  ;;  %v357_v5 = vld [vmem:[%s2085_s26 + $0x50] sm:$0xff]  ;;  %354 = vst [vmem:[%s283_s14 + $0x18] sm:$0xff] %v353_v3 }
  0x21   : > { %356 = vst [vmem:[%s283_s14 + $0x20] sm:$0xff] %v355_v4  ;;  %358 = vst [vmem:[%s283_s14 + $0x28] sm:$0xff] %v357_v5  ;;  %v359_v6 = vld [vmem:[%s2085_s26 + $0x60] sm:$0xff]  ;;  %v361_v7 = vld [vmem:[%s2085_s26 + $0x70] sm:$0xff] }
  0x22   : > { %v363_v8 = vld [vmem:[%s2085_s26 + $0x80] sm:$0xff]  ;;  %360 = vst [vmem:[%s283_s14 + $0x30] sm:$0xff] %v359_v6  ;;  %362 = vst [vmem:[%s283_s14 + $0x38] sm:$0xff] %v361_v7  ;;  %v365_v9 = vld [vmem:[%s2085_s26 + $0x90] sm:$0xff] }
  0x23   : > { %364 = vst [vmem:[%s283_s14 + $0x40] sm:$0xff] %v363_v8  ;;  %v367_v10 = vld [vmem:[%s2085_s26 + $0xa0] sm:$0xff]  ;;  %v369_v11 = vld [vmem:[%s2085_s26 + $0xb0] sm:$0xff]  ;;  %366 = vst [vmem:[%s283_s14 + $0x48] sm:$0xff] %v365_v9 }
  0x24   : > { %368 = vst [vmem:[%s283_s14 + $0x50] sm:$0xff] %v367_v10  ;;  %370 = vst [vmem:[%s283_s14 + $0x58] sm:$0xff] %v369_v11  ;;  %v371_v12 = vld [vmem:[%s2085_s26 + $0xc0] sm:$0xff]  ;;  %v373_v13 = vld [vmem:[%s2085_s26 + $0xd0] sm:$0xff] }
  0x25   : > { %v375_v14 = vld [vmem:[%s2085_s26 + $0xe0] sm:$0xff]  ;;  %372 = vst [vmem:[%s283_s14 + $0x60] sm:$0xff] %v371_v12  ;;  %374 = vst [vmem:[%s283_s14 + $0x68] sm:$0xff] %v373_v13  ;;  %v377_v15 = vld [vmem:[%s2085_s26 + $0xf0] sm:$0xff] }
  0x26   : > { %376 = vst [vmem:[%s283_s14 + $0x70] sm:$0xff] %v375_v14  ;;  %378 = vst [vmem:[%s283_s14 + $0x78] sm:$0xff] %v377_v15 }
  0x27 PF: > { %p1663_p7 = scmp.ge.s32.totalorder %s1975_s11, 1  ;;  %p425_p8 = scmp.lt.s32.totalorder %s1975_s11, 5 }
  0x29   : > { %p426_p9 = pnand %p1663_p7, %p425_p8 }
  0x2a   : > { %s432_s15 = sand.u32 (!%p426_p9), 1, %s1951_s27   ;;  %s1665_s16 = sshll.u32 (!%p426_p9), %s1963_s30, 4 }
  0x2b   : > { %429 = sbr.rel (%p426_p9) target bundleno = 629 (0x275), region = 86  ;;  %s1664_s17 = sshll.u32 (!%p426_p9), %s432_s15, 7 }
  0x2c   : > { %p490_p10 = scmp.lt.s32.totalorder (!%p426_p9), %s1665_s16, 31  ;;  %p495_p11 = scmp.lt.s32.totalorder (!%p426_p9), %s1959_s29, 1 }
  0x2d   : > { %s2408_s1 = sld [smem:[#allocation8_spill]] (!%p426_p9)  ;;  %s2140_s25 = scalar_lea.vmem (!%p426_p9), [#allocation4], %s1664_s17 }
  0x2e   : > { %p1675_p12 = scmp.ne.s32.totalorder (!%p426_p9), %s1959_s29, 0 }
  0x30   : > { %s2424_s16 = smov (!%p490_p10, %s1665_s16), 31 }
  0x31   : > { %s2109_s19 = scalar_select %p495_p11, %s1959_s29, 1 }
  0x32   : > { %s1666_s20 = sshll.u32 %s2424_s16, 3  ;;  %525 = sbr.rel (%p1675_p12) target bundleno = 72 (0x48), region = 94 }
  0x33   : > { %s2114_s23 = scalar_lea.vmem %s2408_s1, %s1666_s20  ;;  %s497_s26 = scalar_lea.vmem %s2394_s2, %s2109_s19 }
  0x34   : > { %s2123_s30 = scalar_lea.vmem %s2397_s5, %s1666_s20  ;;  %s2128_s13 = scalar_lea.vmem %s2398_s6, %s1666_s20 }
  0x35   : > { %s2133_s21 = scalar_lea.vmem %s2399_s7, %s1666_s20  ;;  %s2138_s24 = scalar_lea.vmem %s2400_s8, %s1666_s20 }
  0x37   : > { %v1977_v16 = vmov 0.0  }
  0x38   : > { %526 = vst [vmem:[#allocation2 + $0x30] sm:$0xff] %v1977_v16  ;;  %527 = vst [vmem:[#allocation2] sm:$0xff] %v1977_v16 }
  0x39   : > { %528 = vst [vmem:[#allocation2 + $0x58] sm:$0xff] %v1977_v16  ;;  %529 = vst [vmem:[#allocation2 + $0x18] sm:$0xff] %v1977_v16 }
  0x3a   : > { %530 = vst [vmem:[#allocation2 + $0x50] sm:$0xff] %v1977_v16  ;;  %531 = vst [vmem:[#allocation2 + $0x68] sm:$0xff] %v1977_v16 }
  0x3b   : > { %532 = vst [vmem:[#allocation2 + $0x8] sm:$0xff] %v1977_v16  ;;  %533 = vst [vmem:[#allocation2 + $0x48] sm:$0xff] %v1977_v16 }
  0x3c   : > { %534 = vst [vmem:[#allocation2 + $0x40] sm:$0xff] %v1977_v16  ;;  %535 = vst [vmem:[#allocation2 + $0x20] sm:$0xff] %v1977_v16 }
  0x3d   : > { %536 = vst [vmem:[#allocation2 + $0x10] sm:$0xff] %v1977_v16  ;;  %537 = vst [vmem:[#allocation2 + $0x38] sm:$0xff] %v1977_v16 }
  0x3e   : > { %538 = vst [vmem:[#allocation2 + $0x60] sm:$0xff] %v1977_v16  ;;  %539 = vst [vmem:[#allocation2 + $0x70] sm:$0xff] %v1977_v16 }
  0x3f   : > { %540 = vst [vmem:[#allocation2 + $0x78] sm:$0xff] %v1977_v16  ;;  %541 = vst [vmem:[#allocation2 + $0x28] sm:$0xff] %v1977_v16 }
  0x40   : > { %542 = vst [vmem:[#allocation3 + $0x28] sm:$0xff] %v1977_v16  ;;  %543 = vst [vmem:[#allocation3 + $0x68] sm:$0xff] %v1977_v16 }
  0x41   : > { %544 = vst [vmem:[#allocation3 + $0x10] sm:$0xff] %v1977_v16  ;;  %545 = vst [vmem:[#allocation3 + $0x40] sm:$0xff] %v1977_v16 }
  0x42   : > { %546 = vst [vmem:[#allocation3 + $0x48] sm:$0xff] %v1977_v16  ;;  %547 = vst [vmem:[#allocation3 + $0x30] sm:$0xff] %v1977_v16 }
  0x43   : > { %548 = vst [vmem:[#allocation3 + $0x70] sm:$0xff] %v1977_v16  ;;  %549 = vst [vmem:[#allocation3 + $0x38] sm:$0xff] %v1977_v16 }
  0x44   : > { %550 = vst [vmem:[#allocation3 + $0x20] sm:$0xff] %v1977_v16  ;;  %551 = vst [vmem:[#allocation3 + $0x78] sm:$0xff] %v1977_v16 }
  0x45   : > { %552 = vst [vmem:[#allocation3 + $0x18] sm:$0xff] %v1977_v16  ;;  %553 = vst [vmem:[#allocation3 + $0x58] sm:$0xff] %v1977_v16 }
  0x46   : > { %554 = vst [vmem:[#allocation3] sm:$0xff] %v1977_v16  ;;  %555 = vst [vmem:[#allocation3 + $0x8] sm:$0xff] %v1977_v16 }
  0x47   : > { %556 = vst [vmem:[#allocation3 + $0x60] sm:$0xff] %v1977_v16  ;;  %557 = vst [vmem:[#allocation3 + $0x50] sm:$0xff] %v1977_v16 }
  0x48 PF: > { %v576_v17 = vld [vmem:[%s2114_s23 + $0x10] sm:$0xff]  ;;  %v574_v18 = vld [vmem:[%s2114_s23] sm:$0xff]  ;;  %s1677_s0 = sshll.u32 %s1959_s29, 7  ;;  %v1978_v19 = vmov 0   ;;  %v577_v20 = vld [vmem:[%s2114_s23 + $0x18] sm:$0xff]  ;;  %p1678_p13 = scmp.ne.s32.totalorder %s1959_s29, 1 }
  0x49   : > { %1918 = vset.pattern.permute.xlu1 %v1978_v19  ;;  %1917 = vset.pattern.permute.xlu0 %v1978_v19  ;;  %s2149_s17 = scalar_lea.vmem %s2395_s3, %s1677_s0  ;;  %v575_v21 = vld [vmem:[%s2114_s23 + $0x8] sm:$0xff]  ;;  %s2156_s27 = scalar_lea.vmem %s2396_s4, %s1677_s0  ;;  %v578_v27 = vld [vmem:[%s2114_s23 + $0x20] sm:$0xff]  ;;  %v581_v30 = vld [vmem:[%s2114_s23 + $0x38] sm:$0xff] }
  0x4a   : > { %603 = vperm.xlu1 %1918, %v576_v17   ;;  %593 = vperm.xlu0 %1917, %v574_v18   ;;  %v790_v22 = vld [vmem:[%s2149_s17 + $0x78] sm:$0xff]  ;;  %v789_v23 = vld [vmem:[%s2149_s17 + $0x70] sm:$0xff]  ;;  %v579_v26 = vld [vmem:[%s2114_s23 + $0x28] sm:$0xff] }
  0x4b   : > { %v807_v24 = vld [vmem:[%s2156_s27 + $0x78] sm:$0xff]  ;;  %v806_v25 = vld [vmem:[%s2156_s27 + $0x70] sm:$0xff]  ;;  %1746 = vmatprep.subr.mxu0 %v790_v22  ;;  %v788_v28 = vld [vmem:[%s2149_s17 + $0x68] sm:$0xff] }
  0x4c   : > { %1802 = vmatprep.subr.mxu1 %v807_v24  ;;  %1747 = vmatpush3.msra.mxu0 %v790_v22  ;;  %v805_v29 = vld [vmem:[%s2156_s27 + $0x68] sm:$0xff]  ;;  %v580_v31 = vld [vmem:[%s2114_s23 + $0x30] sm:$0xff]  ;;  %v787_v32 = vld [vmem:[%s2149_s17 + $0x60] sm:$0xff] }
  0x4d   : > { %1803 = vmatpush3.msra.mxu1 %v807_v24  ;;  %1748 = vmatprep.subr.mxu0 %v789_v23  ;;  %v804_v33 = vld [vmem:[%s2156_s27 + $0x60] sm:$0xff]  ;;  %v786_v34 = vld [vmem:[%s2149_s17 + $0x58] sm:$0xff]  ;;  %v583_v36 = vld [vmem:[%s2114_s23 + $0x48] sm:$0xff] }
  0x4e   : > { %608 = vperm.xlu1 %1918, %v577_v20   ;;  %598 = vperm.xlu0 %1917, %v575_v21   ;;  %v803_v35 = vld [vmem:[%s2156_s27 + $0x58] sm:$0xff]  ;;  %v582_v37 = vld [vmem:[%s2114_s23 + $0x40] sm:$0xff]  ;;  %v785_v38 = vld [vmem:[%s2149_s17 + $0x50] sm:$0xff] }
  0x4f   : > { %1804 = vmatprep.subr.mxu1 %v806_v25  ;;  %1749 = vmatpush3.msra.mxu0 %v789_v23  ;;  %v802_v39 = vld [vmem:[%s2156_s27 + $0x50] sm:$0xff]  ;;  %v585_v40 = vld [vmem:[%s2114_s23 + $0x58] sm:$0xff]  ;;  %v784_v42 = vld [vmem:[%s2149_s17 + $0x48] sm:$0xff] }
  0x50   : > { %1805 = vmatpush3.msra.mxu1 %v806_v25  ;;  %1750 = vmatprep.subr.mxu0 %v788_v28  ;;  %v584_v41 = vld [vmem:[%s2114_s23 + $0x50] sm:$0xff]  ;;  %v801_v43 = vld [vmem:[%s2156_s27 + $0x48] sm:$0xff]  ;;  %v783_v44 = vld [vmem:[%s2149_s17 + $0x40] sm:$0xff] }
  0x51   : > { %1806 = vmatprep.subr.mxu1 %v805_v29  ;;  %1751 = vmatpush3.msra.mxu0 %v788_v28  ;;  %v800_v45 = vld [vmem:[%s2156_s27 + $0x40] sm:$0xff]  ;;  %v587_v46 = vld [vmem:[%s2114_s23 + $0x68] sm:$0xff]  ;;  %v782_v48 = vld [vmem:[%s2149_s17 + $0x38] sm:$0xff] }
  0x52   : > { %618 = vperm.xlu1 %1918, %v579_v26   ;;  %613 = vperm.xlu0 %1917, %v578_v27   ;;  %v586_v47 = vld [vmem:[%s2114_s23 + $0x60] sm:$0xff]  ;;  %v799_v49 = vld [vmem:[%s2156_s27 + $0x38] sm:$0xff]  ;;  %v588_v51 = vld [vmem:[%s2114_s23 + $0x70] sm:$0xff] }
  0x53   : > { %1807 = vmatpush3.msra.mxu1 %v805_v29  ;;  %1752 = vmatprep.subr.mxu0 %v787_v32  ;;  %v589_v50 = vld [vmem:[%s2114_s23 + $0x78] sm:$0xff]  ;;  %v781_v52 = vld [vmem:[%s2149_s17 + $0x30] sm:$0xff]  ;;  %v780_v54 = vld [vmem:[%s2149_s17 + $0x28] sm:$0xff] }
  0x54   : > { %1808 = vmatprep.subr.mxu1 %v804_v33  ;;  %1753 = vmatpush3.msra.mxu0 %v787_v32  ;;  %v798_v53 = vld [vmem:[%s2156_s27 + $0x30] sm:$0xff]  ;;  %v797_v55 = vld [vmem:[%s2156_s27 + $0x28] sm:$0xff]  ;;  %v779_v56 = vld [vmem:[%s2149_s17 + $0x20] sm:$0xff] }
  0x55   : > { %1809 = vmatpush3.msra.mxu1 %v804_v33  ;;  %1754 = vmatprep.subr.mxu0 %v786_v34  ;;  %v796_v57 = vld [vmem:[%s2156_s27 + $0x20] sm:$0xff]  ;;  %v778_v58 = vld [vmem:[%s2149_s17 + $0x18] sm:$0xff]  ;;  %v777_v60 = vld [vmem:[%s2149_s17 + $0x10] sm:$0xff] }
  0x56   : > { %628 = vperm.xlu1 %1918, %v581_v30   ;;  %623 = vperm.xlu0 %1917, %v580_v31   ;;  %v795_v59 = vld [vmem:[%s2156_s27 + $0x18] sm:$0xff]  ;;  %v794_v61 = vld [vmem:[%s2156_s27 + $0x10] sm:$0xff]  ;;  %v776_v62 = vld [vmem:[%s2149_s17 + $0x8] sm:$0xff] }
  0x57   : > { %1810 = vmatprep.subr.mxu1 %v803_v35  ;;  %1755 = vmatpush3.msra.mxu0 %v786_v34  ;;  %v793_v63 = vld [vmem:[%s2156_s27 + $0x8] sm:$0xff]  ;;  %v775_v0 = vld [vmem:[%s2149_s17] sm:$0xff]  ;;  %v558_v3 = vld [vmem:[%s2140_s25] sm:$0xff] }
  0x58   : > { %1811 = vmatpush3.msra.mxu1 %v803_v35  ;;  %1756 = vmatprep.subr.mxu0 %v785_v38  ;;  %v792_v1 = vld [vmem:[%s2156_s27] sm:$0xff]  ;;  %v693_v6 = vand.u32 2147483647, %v558_v3  ;;  %v561_v9 = vld [vmem:[%s2140_s25 + $0x18] sm:$0xff]  ;;  %v559_v10 = vld [vmem:[%s2140_s25 + $0x8] sm:$0xff] }
  0x59   : > { %1812 = vmatprep.subr.mxu1 %v802_v39  ;;  %1757 = vmatpush3.msra.mxu0 %v785_v38  ;;  %v560_v2 = vld [vmem:[%s2140_s25 + $0x10] sm:$0xff]  ;;  %v696_v14 = vand.u32 2147483647, %v561_v9  ;;  %v694_v15 = vand.u32 2147483647, %v559_v10  ;;  %v2216_v19 = vld [vmem:[%s2140_s25 + $0x28] sm:$0xff] }
  0x5a   : > { %638 = vperm.xlu1 %1918, %v583_v36   ;;  %633 = vperm.xlu0 %1917, %v582_v37   ;;  %v2209_v4 = vld [vmem:[%s497_s26] ss:$0 sm:$0xff]  ;;  %v695_v5 = vand.u32 2147483647, %v560_v2  ;;  %v562_v20 = vld [vmem:[%s2140_s25 + $0x20] sm:$0xff]  ;;  %v2223_v30 = vld [vmem:[%s2140_s25 + $0x38] sm:$0xff] }
  0x5b   : > { %1813 = vmatpush3.msra.mxu1 %v802_v39  ;;  %1758 = vmatprep.subr.mxu0 %v784_v42  ;;  %v698_v28 = vand.u32 2147483647, %v2216_v19  ;;  %v697_v29 = vand.u32 2147483647, %v562_v20  ;;  %v564_v34 = vld [vmem:[%s2140_s25 + $0x30] sm:$0xff] }
  0x5c   : > { %1814 = vmatprep.subr.mxu1 %v801_v43  ;;  %1759 = vmatpush3.msra.mxu0 %v784_v42 }
  0x5d   : > { %1815 = vmatpush3.msra.mxu1 %v801_v43  ;;  %1760 = vmatprep.subr.mxu0 %v783_v44  ;;  %v2230_v43 = vld [vmem:[%s2140_s25 + $0x48] sm:$0xff] }
  0x5e   : > { %648 = vperm.xlu1 %1918, %v585_v40   ;;  %643 = vperm.xlu0 %1917, %v584_v41   ;;  %v700_v41 = vand.u32 2147483647, %v2223_v30 }
  0x5f   : > { %1816 = vmatprep.subr.mxu1 %v800_v45  ;;  %1761 = vmatpush3.msra.mxu0 %v783_v44 }
  0x60   : > { %1817 = vmatpush3.msra.mxu1 %v800_v45  ;;  %1762 = vmatprep.subr.mxu0 %v782_v48 }
  0x61   : > { %1818 = vmatprep.subr.mxu1 %v799_v49  ;;  %1763 = vmatpush3.msra.mxu0 %v782_v48  ;;  %v2233_v48 = vld [vmem:[%s2140_s25 + $0x40] sm:$0xff] }
  0x62   : > { %658 = vperm.xlu1 %1918, %v587_v46   ;;  %653 = vperm.xlu0 %1917, %v586_v47   ;;  %v699_v46 = vand.u32 2147483647, %v564_v34 }
  0x63   : > { %1819 = vmatpush3.msra.mxu1 %v799_v49  ;;  %1764 = vmatprep.subr.mxu0 %v781_v52 }
  0x64   : > { %1820 = vmatprep.subr.mxu1 %v798_v53  ;;  %1765 = vmatpush3.msra.mxu0 %v781_v52 }
  0x65   : > { %1821 = vmatpush3.msra.mxu1 %v798_v53  ;;  %1766 = vmatprep.subr.mxu0 %v780_v54 }
  0x66   : > { %668 = vperm.xlu1 %1918, %v589_v50   ;;  %663 = vperm.xlu0 %1917, %v588_v51  }
  0x67   : > { %1822 = vmatprep.subr.mxu1 %v797_v55  ;;  %1767 = vmatpush3.msra.mxu0 %v780_v54  ;;  %v702_v54 = vand.u32 2147483647, %v2230_v43 }
  0x68   : > { %1823 = vmatpush3.msra.mxu1 %v797_v55  ;;  %1768 = vmatprep.subr.mxu0 %v779_v56 }
  0x69   : > { %1824 = vmatprep.subr.mxu1 %v796_v57  ;;  %1769 = vmatpush3.msra.mxu0 %v779_v56  ;;  %v701_v56 = vand.u32 2147483647, %v2233_v48 }
  0x6a   : > { %1825 = vmatpush3.msra.mxu1 %v796_v57  ;;  %1770 = vmatprep.subr.mxu0 %v778_v58 }
  0x6b   : > { %1826 = vmatprep.subr.mxu1 %v795_v59  ;;  %1771 = vmatpush3.msra.mxu0 %v778_v58 }
  0x6c   : > { %1827 = vmatpush3.msra.mxu1 %v795_v59  ;;  %1772 = vmatprep.subr.mxu0 %v777_v60  ;;  %v2240_v59 = vld [vmem:[%s2140_s25 + $0x58] sm:$0xff] }
  0x6d   : > { %1828 = vmatprep.subr.mxu1 %v794_v61  ;;  %1773 = vmatpush3.msra.mxu0 %v777_v60 }
  0x6e   : > { %1829 = vmatpush3.msra.mxu1 %v794_v61  ;;  %1774 = vmatprep.subr.mxu0 %v776_v62 }
  0x6f   : > { %1830 = vmatprep.subr.mxu1 %v793_v63  ;;  %1775 = vmatpush3.msra.mxu0 %v776_v62 }
  0x70   : > { %1831 = vmatpush3.msra.mxu1 %v793_v63  ;;  %1776 = vmatprep.subr.mxu0 %v775_v0 }
  0x71   : > { %1832 = vmatprep.subr.mxu1 %v792_v1  ;;  %1777 = vmatpush3.msra.mxu0 %v775_v0  ;;  %v2243_v0 = vld [vmem:[%s2140_s25 + $0x50] sm:$0xff] }
  0x72   : > { %1833 = vmatpush3.msra.mxu1 %v792_v1 }
  0xc5   : > { %v604_v7 = vpop.permute.xlu1 %603  ;;  %v594_v8 = vpop.permute.xlu0 %593 }
  0xc6   : > { %v679_v11 = vmax.f32 %v604_v7, %v2209_v4  ;;  %v677_v12 = vmax.f32 %v594_v8, %v2209_v4  ;;  %v704_v7 = vand.u32 2147483647, %v2240_v59 }
  0xc8   : > { %v711_v13 = vmul.f32 %v695_v5, %v679_v11  ;;  %v709_v16 = vmul.f32 %v693_v6, %v677_v12  ;;  %v2251_v12 = vld [vmem:[%s2140_s25 + $0x68] sm:$0xff] }
  0xc9   : > { %v609_v17 = vpop.permute.xlu1 %608  ;;  %v599_v18 = vpop.permute.xlu0 %598 }
  0xca   : > { %v680_v21 = vmax.f32 %v609_v17, %v2209_v4  ;;  %v678_v22 = vmax.f32 %v599_v18, %v2209_v4  ;;  %v725_v23 = vmax.f32 %v558_v3, %v709_v16  ;;  %v743_v24 = vsub.f32 0.0, %v711_v13  ;;  %v570_v17 = vld [vmem:[%s2140_s25 + $0x60] sm:$0xff] }
  0xcb   : > { %v741_v25 = vsub.f32 0.0, %v709_v16  ;;  %v727_v38 = vmax.f32 %v560_v2, %v711_v13 }
  0xcc   : > { %v712_v26 = vmul.f32 %v696_v14, %v680_v21  ;;  %v710_v27 = vmul.f32 %v694_v15, %v678_v22  ;;  %1778 = vmatprep.mubr.f32.mxu0 %v725_v23  ;;  %v759_v42 = vmin.f32 %v560_v2, %v743_v24  ;;  %v706_v24 = vand.u32 2147483647, %v2251_v12 }
  0xcd   : > { %v619_v31 = vpop.permute.xlu1 %618  ;;  %v614_v32 = vpop.permute.xlu0 %613  ;;  %v757_v33 = vmin.f32 %v558_v3, %v741_v25 }
  0xce   : > { %v742_v35 = vsub.f32 0.0, %v710_v27  ;;  %v682_v36 = vmax.f32 %v619_v31, %v2209_v4  ;;  %v681_v37 = vmax.f32 %v614_v32, %v2209_v4  ;;  %v744_v39 = vsub.f32 0.0, %v712_v26 }
  0xcf   : > { %1834 = vmatprep.mubr.f32.mxu1 %v757_v33  ;;  %v726_v40 = vmax.f32 %v559_v10, %v710_v27  ;;  %v728_v55 = vmax.f32 %v561_v9, %v712_v26 }
  0xd0   : > { %v714_v44 = vmul.f32 %v698_v28, %v682_v36  ;;  %v713_v45 = vmul.f32 %v697_v29, %v681_v37  ;;  %v758_v47 = vmin.f32 %v559_v10, %v742_v35  ;;  %v760_v58 = vmin.f32 %v561_v9, %v744_v39  ;;  %v573_v28 = vld [vmem:[%s2140_s25 + $0x78] sm:$0xff] }
  0xd1   : > { %1779 = vmatmul.mubr.f32.vlgmr.msra.gmra.mxu0 %v726_v40  ;;  %v629_v49 = vpop.permute.xlu1 %628  ;;  %v624_v50 = vpop.permute.xlu0 %623  ;;  %v703_v10 = vand.u32 2147483647, %v2243_v0  ;;  %v708_v40 = vand.u32 2147483647, %v573_v28 }
  0xd2   : > { %v745_v51 = vsub.f32 0.0, %v713_v45  ;;  %v684_v52 = vmax.f32 %v629_v49, %v2209_v4  ;;  %v683_v53 = vmax.f32 %v624_v50, %v2209_v4  ;;  %1781 = vmatprep.mubr.f32.mxu0 %v727_v38  ;;  %1835 = vmatmul.mubr.f32.vlgmr.msra.gmra.mxu1 %v758_v47  ;;  %v729_v57 = vmax.f32 %v562_v20, %v713_v45 }
  0xd3   : > { %1837 = vmatprep.mubr.f32.mxu1 %v759_v42  ;;  %v746_v60 = vsub.f32 0.0, %v714_v44  ;;  %v730_v9 = vmax.f32 %v2216_v19, %v714_v44 }
  0xd4   : > { %v716_v61 = vmul.f32 %v700_v41, %v684_v52  ;;  %v715_v62 = vmul.f32 %v699_v46, %v683_v53  ;;  %v761_v63 = vmin.f32 %v562_v20, %v745_v51 }
  0xd5   : > { %1782 = vmatmul.mubr.f32.gmra.mxu0 %v728_v55  ;;  %v639_v1 = vpop.permute.xlu1 %638  ;;  %v634_v2 = vpop.permute.xlu0 %633  ;;  %v762_v15 = vmin.f32 %v2216_v19, %v746_v60  ;;  %v705_v19 = vand.u32 2147483647, %v570_v17 }
  0xd6   : > { %v747_v3 = vsub.f32 0.0, %v715_v62  ;;  %v686_v5 = vmax.f32 %v639_v1, %v2209_v4  ;;  %v685_v6 = vmax.f32 %v634_v2, %v2209_v4  ;;  %1784 = vmatprep.mubr.f32.mxu0 %v729_v57  ;;  %1838 = vmatmul.mubr.f32.gmra.mxu1 %v760_v58  ;;  %v748_v8 = vsub.f32 0.0, %v716_v61 }
  0xd7   : > { %1840 = vmatprep.mubr.f32.mxu1 %v761_v63  ;;  %v731_v11 = vmax.f32 %v564_v34, %v715_v62  ;;  %v732_v25 = vmax.f32 %v2223_v30, %v716_v61 }
  0xd8   : > { %v718_v13 = vmul.f32 %v702_v54, %v686_v5  ;;  %v717_v14 = vmul.f32 %v701_v56, %v685_v6  ;;  %v763_v16 = vmin.f32 %v564_v34, %v747_v3  ;;  %v764_v27 = vmin.f32 %v2223_v30, %v748_v8  ;;  %v572_v34 = vld [vmem:[%s2140_s25 + $0x70] sm:$0xff]  ;;  %v809_v3 = vld [vmem:[#allocation2] sm:$0xff]  ;;  %v1002_v5 = vld [vmem:[#allocation3 + $0x68] sm:$0xff] }
  0xd9   : > { %1785 = vmatmul.mubr.f32.gmra.mxu0 %v730_v9  ;;  %v649_v18 = vpop.permute.xlu1 %648  ;;  %v644_v20 = vpop.permute.xlu0 %643  ;;  %v707_v42 = vand.u32 2147483647, %v572_v34 }
  0xda   : > { %v749_v21 = vsub.f32 0.0, %v717_v14  ;;  %v688_v22 = vmax.f32 %v649_v18, %v2209_v4  ;;  %v687_v23 = vmax.f32 %v644_v20, %v2209_v4  ;;  %1787 = vmatprep.mubr.f32.mxu0 %v731_v11  ;;  %1841 = vmatmul.mubr.f32.gmra.mxu1 %v762_v15  ;;  %v733_v26 = vmax.f32 %v2233_v48, %v717_v14  ;;  %v811_v14 = vld [vmem:[#allocation2 + $0x18] sm:$0xff] }
  0xdb   : > { %1843 = vmatprep.mubr.f32.mxu1 %v763_v16  ;;  %v750_v29 = vsub.f32 0.0, %v718_v13  ;;  %v734_v30 = vmax.f32 %v2230_v43, %v718_v13  ;;  %v1004_v16 = vld [vmem:[#allocation3 + $0x40] sm:$0xff]  ;;  %v810_v20 = vld [vmem:[#allocation2 + $0x58] sm:$0xff] }
  0xdc   : > { %v720_v31 = vmul.f32 %v704_v7, %v688_v22  ;;  %v719_v32 = vmul.f32 %v703_v10, %v687_v23  ;;  %v765_v33 = vmin.f32 %v2233_v48, %v749_v21  ;;  %v808_v7 = vld [vmem:[#allocation2 + $0x30] sm:$0xff]  ;;  %v1001_v10 = vld [vmem:[#allocation3 + $0x28] sm:$0xff] }
  0xdd   : > { %1788 = vmatmul.mubr.f32.gmra.mxu0 %v732_v25  ;;  %v659_v35 = vpop.permute.xlu1 %658  ;;  %v654_v36 = vpop.permute.xlu0 %653  ;;  %v766_v47 = vmin.f32 %v2230_v43, %v750_v29  ;;  %v1003_v23 = vld [vmem:[#allocation3 + $0x10] sm:$0xff] }
  0xde   : > { %v751_v37 = vsub.f32 0.0, %v719_v32  ;;  %v690_v38 = vmax.f32 %v659_v35, %v2209_v4  ;;  %v689_v39 = vmax.f32 %v654_v36, %v2209_v4  ;;  %1790 = vmatprep.mubr.f32.mxu0 %v733_v26  ;;  %1844 = vmatmul.mubr.f32.gmra.mxu1 %v764_v27  ;;  %v752_v41 = vsub.f32 0.0, %v720_v31  ;;  %v1005_v35 = vld [vmem:[#allocation3 + $0x48] sm:$0xff] }
  0xdf   : > { %1846 = vmatprep.mubr.f32.mxu1 %v765_v33  ;;  %v735_v44 = vmax.f32 %v2243_v0, %v719_v32  ;;  %v736_v54 = vmax.f32 %v2240_v59, %v720_v31  ;;  %v812_v32 = vld [vmem:[#allocation2 + $0x50] sm:$0xff] }
  0xe0   : > { %v722_v45 = vmul.f32 %v706_v24, %v690_v38  ;;  %v721_v46 = vmul.f32 %v705_v19, %v689_v39  ;;  %v767_v48 = vmin.f32 %v2243_v0, %v751_v37  ;;  %v768_v56 = vmin.f32 %v2240_v59, %v752_v41  ;;  %v813_v19 = vld [vmem:[#allocation2 + $0x68] sm:$0xff]  ;;  %v1008_v41 = vld [vmem:[#allocation3 + $0x38] sm:$0xff] }
  0xe1   : > { %1791 = vmatmul.mubr.f32.gmra.mxu0 %v734_v30  ;;  %v669_v49 = vpop.permute.xlu1 %668  ;;  %v664_v50 = vpop.permute.xlu0 %663  ;;  %v815_v38 = vld [vmem:[#allocation2 + $0x48] sm:$0xff] }
  0xe2   : > { %v753_v51 = vsub.f32 0.0, %v721_v46  ;;  %v692_v52 = vmax.f32 %v669_v49, %v2209_v4  ;;  %v691_v53 = vmax.f32 %v664_v50, %v2209_v4  ;;  %1793 = vmatprep.mubr.f32.mxu0 %v735_v44  ;;  %1847 = vmatmul.mubr.f32.gmra.mxu1 %v766_v47  ;;  %v737_v55 = vmax.f32 %v570_v17, %v721_v46  ;;  %v814_v44 = vld [vmem:[#allocation2 + $0x8] sm:$0xff]  ;;  %v1007_v47 = vld [vmem:[#allocation3 + $0x70] sm:$0xff]  ;;  %v817_v50 = vld [vmem:[#allocation2 + $0x20] sm:$0xff] }
  0xe3   : > { %1849 = vmatprep.mubr.f32.mxu1 %v767_v48  ;;  %v754_v57 = vsub.f32 0.0, %v722_v45  ;;  %v738_v4 = vmax.f32 %v2251_v12, %v722_v45 }
  0xe4   : > { %v724_v43 = vmul.f32 %v708_v40, %v692_v52  ;;  %v723_v58 = vmul.f32 %v707_v42, %v691_v53  ;;  %v769_v60 = vmin.f32 %v570_v17, %v753_v51  ;;  %v1010_v53 = vld [vmem:[#allocation3 + $0x78] sm:$0xff] }
  0xe5   : > { %1794 = vmatmul.mubr.f32.gmra.mxu0 %v736_v54  ;;  %v770_v0 = vmin.f32 %v2251_v12, %v754_v57 }
  0xe6   : > { %v755_v61 = vsub.f32 0.0, %v723_v58  ;;  %1796 = vmatprep.mubr.f32.mxu0 %v737_v55  ;;  %1850 = vmatmul.mubr.f32.gmra.mxu1 %v768_v56  ;;  %v739_v62 = vmax.f32 %v572_v34, %v723_v58  ;;  %v756_v63 = vsub.f32 0.0, %v724_v43  ;;  %v740_v59 = vmax.f32 %v573_v28, %v724_v43  ;;  %v816_v56 = vld [vmem:[#allocation2 + $0x40] sm:$0xff] }
  0xe7   : > { %1852 = vmatprep.mubr.f32.mxu1 %v769_v60  ;;  %v1009_v58 = vld [vmem:[#allocation3 + $0x20] sm:$0xff] }
  0xe8   : > { %v771_v1 = vmin.f32 %v572_v34, %v755_v61  ;;  %v772_v2 = vmin.f32 %v573_v28, %v756_v63  ;;  %v1006_v28 = vld [vmem:[#allocation3 + $0x30] sm:$0xff] }
  0xe9   : > { %1797 = vmatmul.mubr.f32.gmra.mxu0 %v738_v4 }
  0xea   : > { %1799 = vmatprep.mubr.f32.mxu0 %v739_v62  ;;  %1853 = vmatmul.mubr.f32.gmra.mxu1 %v770_v0  ;;  %v819_v62 = vld [vmem:[#allocation2 + $0x38] sm:$0xff] }
  0xeb   : > { %1855 = vmatprep.mubr.f32.mxu1 %v771_v1  ;;  %v1012_v0 = vld [vmem:[#allocation3 + $0x58] sm:$0xff] }
  0xed   : > { %1800 = vmatmul.mubr.f32.gmra.mxu0 %v740_v59 }
  0xee   : > { %1856 = vmatmul.mubr.f32.gmra.mxu1 %v772_v2  ;;  %v818_v2 = vld [vmem:[#allocation2 + $0x10] sm:$0xff] }
 0x191   : > { %v1780_v6 = vpop.f32.mrf.mxu0 }
 0x192   : > { %v970_v8 = vadd.f32 %v1780_v6, %v809_v3  ;;  %v1836_v9 = vpop.f32.mrf.mxu1  ;;  %v1011_v6 = vld [vmem:[#allocation3 + $0x18] sm:$0xff] }
 0x193   : > { %v890_v11 = vpop.f32.mrf.mxu0  ;;  %v1163_v13 = vadd.f32 %v1836_v9, %v1002_v5  ;;  %v821_v9 = vld [vmem:[#allocation2 + $0x70] sm:$0xff] }
 0x194   : > { %986 = vst [vmem:[#allocation2] sm:$0xff] %v970_v8  ;;  %v969_v12 = vadd.f32 %v890_v11, %v808_v7  ;;  %v1083_v15 = vpop.f32.mrf.mxu1 }
 0x195   : > { %1179 = vst [vmem:[#allocation3 + $0x68] sm:$0xff] %v1163_v13  ;;  %v1783_v17 = vpop.f32.mrf.mxu0  ;;  %v1162_v18 = vadd.f32 %v1083_v15, %v1001_v10  ;;  %v1014_v13 = vld [vmem:[#allocation3 + $0x8] sm:$0xff]  ;;  %v820_v15 = vld [vmem:[#allocation2 + $0x60] sm:$0xff] }
 0x196   : > { %985 = vst [vmem:[#allocation2 + $0x30] sm:$0xff] %v969_v12  ;;  %v972_v21 = vadd.f32 %v1783_v17, %v811_v14  ;;  %v1839_v22 = vpop.f32.mrf.mxu1 }
 0x197   : > { %1178 = vst [vmem:[#allocation3 + $0x28] sm:$0xff] %v1162_v18  ;;  %v900_v24 = vpop.f32.mrf.mxu0  ;;  %v1165_v25 = vadd.f32 %v1839_v22, %v1004_v16  ;;  %v1013_v18 = vld [vmem:[#allocation3] sm:$0xff]  ;;  %v823_v22 = vld [vmem:[#allocation2 + $0x28] sm:$0xff] }
 0x198   : > { %988 = vst [vmem:[#allocation2 + $0x18] sm:$0xff] %v972_v21  ;;  %v971_v26 = vadd.f32 %v900_v24, %v810_v20  ;;  %v1093_v27 = vpop.f32.mrf.mxu1 }
 0x199   : > { %1181 = vst [vmem:[#allocation3 + $0x40] sm:$0xff] %v1165_v25  ;;  %v1786_v29 = vpop.f32.mrf.mxu0  ;;  %v1164_v31 = vadd.f32 %v1093_v27, %v1003_v23  ;;  %v1016_v25 = vld [vmem:[#allocation3 + $0x50] sm:$0xff]  ;;  %v822_v27 = vld [vmem:[#allocation2 + $0x78] sm:$0xff] }
 0x19a   : > { %987 = vst [vmem:[#allocation2 + $0x58] sm:$0xff] %v971_v26  ;;  %v974_v33 = vadd.f32 %v1786_v29, %v813_v19  ;;  %v1842_v34 = vpop.f32.mrf.mxu1 }
 0x19b   : > { %1180 = vst [vmem:[#allocation3 + $0x10] sm:$0xff] %v1164_v31  ;;  %v910_v36 = vpop.f32.mrf.mxu0  ;;  %v1167_v37 = vadd.f32 %v1842_v34, %v1006_v28  ;;  %v1015_v31 = vld [vmem:[#allocation3 + $0x60] sm:$0xff] }
 0x19c   : > { %990 = vst [vmem:[#allocation2 + $0x68] sm:$0xff] %v974_v33  ;;  %v973_v39 = vadd.f32 %v910_v36, %v812_v32  ;;  %v1103_v40 = vpop.f32.mrf.mxu1 }
 0x19d   : > { %1183 = vst [vmem:[#allocation3 + $0x30] sm:$0xff] %v1167_v37  ;;  %v1789_v30 = vpop.f32.mrf.mxu0  ;;  %v1166_v42 = vadd.f32 %v1103_v40, %v1005_v35 }
 0x19e   : > { %989 = vst [vmem:[#allocation2 + $0x50] sm:$0xff] %v973_v39  ;;  %v976_v45 = vadd.f32 %v1789_v30, %v815_v38  ;;  %v1845_v46 = vpop.f32.mrf.mxu1 }
 0x19f   : > { %1182 = vst [vmem:[#allocation3 + $0x48] sm:$0xff] %v1166_v42  ;;  %v920_v48 = vpop.f32.mrf.mxu0  ;;  %v1169_v49 = vadd.f32 %v1845_v46, %v1008_v41 }
 0x1a0   : > { %992 = vst [vmem:[#allocation2 + $0x48] sm:$0xff] %v976_v45  ;;  %v975_v51 = vadd.f32 %v920_v48, %v814_v44  ;;  %v1113_v52 = vpop.f32.mrf.mxu1 }
 0x1a1   : > { %1185 = vst [vmem:[#allocation3 + $0x38] sm:$0xff] %v1169_v49  ;;  %v1792_v54 = vpop.f32.mrf.mxu0  ;;  %v1168_v55 = vadd.f32 %v1113_v52, %v1007_v47 }
 0x1a2   : > { %991 = vst [vmem:[#allocation2 + $0x8] sm:$0xff] %v975_v51  ;;  %v978_v57 = vadd.f32 %v1792_v54, %v817_v50  ;;  %v1848_v43 = vpop.f32.mrf.mxu1 }
 0x1a3   : > { %1184 = vst [vmem:[#allocation3 + $0x70] sm:$0xff] %v1168_v55  ;;  %v930_v60 = vpop.f32.mrf.mxu0  ;;  %v1171_v61 = vadd.f32 %v1848_v43, %v1010_v53 }
 0x1a4   : > { %994 = vst [vmem:[#allocation2 + $0x20] sm:$0xff] %v978_v57  ;;  %v977_v4 = vadd.f32 %v930_v60, %v816_v56  ;;  %v1123_v63 = vpop.f32.mrf.mxu1 }
 0x1a5   : > { %1187 = vst [vmem:[#allocation3 + $0x78] sm:$0xff] %v1171_v61  ;;  %v1795_v1 = vpop.f32.mrf.mxu0  ;;  %v1170_v59 = vadd.f32 %v1123_v63, %v1009_v58 }
 0x1a6   : > { %993 = vst [vmem:[#allocation2 + $0x40] sm:$0xff] %v977_v4  ;;  %v980_v3 = vadd.f32 %v1795_v1, %v819_v62  ;;  %v1851_v5 = vpop.f32.mrf.mxu1 }
 0x1a7   : > { %1186 = vst [vmem:[#allocation3 + $0x20] sm:$0xff] %v1170_v59  ;;  %v940_v7 = vpop.f32.mrf.mxu0  ;;  %v1173_v8 = vadd.f32 %v1851_v5, %v1012_v0 }
 0x1a8   : > { %996 = vst [vmem:[#allocation2 + $0x38] sm:$0xff] %v980_v3  ;;  %v979_v10 = vadd.f32 %v940_v7, %v818_v2  ;;  %v1133_v11 = vpop.f32.mrf.mxu1 }
 0x1a9   : > { %1189 = vst [vmem:[#allocation3 + $0x58] sm:$0xff] %v1173_v8  ;;  %v1798_v14 = vpop.f32.mrf.mxu0  ;;  %v1172_v12 = vadd.f32 %v1133_v11, %v1011_v6 }
 0x1aa   : > { %995 = vst [vmem:[#allocation2 + $0x10] sm:$0xff] %v979_v10  ;;  %v982_v16 = vadd.f32 %v1798_v14, %v821_v9  ;;  %v1854_v17 = vpop.f32.mrf.mxu1 }
 0x1ab   : > { %1188 = vst [vmem:[#allocation3 + $0x18] sm:$0xff] %v1172_v12  ;;  %v950_v20 = vpop.f32.mrf.mxu0  ;;  %v1175_v21 = vadd.f32 %v1854_v17, %v1014_v13 }
 0x1ac   : > { %998 = vst [vmem:[#allocation2 + $0x70] sm:$0xff] %v982_v16  ;;  %v981_v23 = vadd.f32 %v950_v20, %v820_v15  ;;  %v1143_v24 = vpop.f32.mrf.mxu1 }
 0x1ad   : > { %1191 = vst [vmem:[#allocation3 + $0x8] sm:$0xff] %v1175_v21  ;;  %v1801_v19 = vpop.f32.mrf.mxu0  ;;  %v1174_v26 = vadd.f32 %v1143_v24, %v1013_v18 }
 0x1ae   : > { %997 = vst [vmem:[#allocation2 + $0x60] sm:$0xff] %v981_v23  ;;  %v984_v28 = vadd.f32 %v1801_v19, %v823_v22  ;;  %v1857_v29 = vpop.f32.mrf.mxu1 }
 0x1af   : > { %1190 = vst [vmem:[#allocation3] sm:$0xff] %v1174_v26  ;;  %v960_v32 = vpop.f32.mrf.mxu0  ;;  %v1177_v33 = vadd.f32 %v1857_v29, %v1016_v25  ;;  %1197 = sbr.rel (%p1678_p13) target bundleno = 629 (0x275), region = 98 }
 0x1b0   : > { %1000 = vst [vmem:[#allocation2 + $0x28] sm:$0xff] %v984_v28  ;;  %v983_v34 = vadd.f32 %v960_v32, %v822_v27  ;;  %v1153_v35 = vpop.f32.mrf.mxu1 }
 0x1b1   : > { %1193 = vst [vmem:[#allocation3 + $0x50] sm:$0xff] %v1177_v33  ;;  %v1176_v36 = vadd.f32 %v1153_v35, %v1015_v31 }
 0x1b2   : > { %999 = vst [vmem:[#allocation2 + $0x78] sm:$0xff] %v983_v34 }
 0x1b3   : > { %1192 = vst [vmem:[#allocation3 + $0x60] sm:$0xff] %v1176_v36 }
 0x1b4   : > { %v1200_v37 = vld [vmem:[%s2123_s30 + $0x10] sm:$0xff]  ;;  %v1198_v38 = vld [vmem:[%s2123_s30] sm:$0xff]  ;;  %v1979_v39 = vmov 0   ;;  %v1201_v40 = vld [vmem:[%s2123_s30 + $0x18] sm:$0xff] }
 0x1b5   : > { %1920 = vset.pattern.permute.xlu1 %v1979_v39  ;;  %1919 = vset.pattern.permute.xlu0 %v1979_v39  ;;  %v1199_v41 = vld [vmem:[%s2123_s30 + $0x8] sm:$0xff]  ;;  %v1202_v42 = vld [vmem:[%s2123_s30 + $0x20] sm:$0xff]  ;;  %v1205_v44 = vld [vmem:[%s2123_s30 + $0x38] sm:$0xff] }
 0x1b6   : > { %1242 = vperm.xlu1 %1920, %v1200_v37   ;;  %1232 = vperm.xlu0 %1919, %v1198_v38   ;;  %v1203_v30 = vld [vmem:[%s2123_s30 + $0x28] sm:$0xff]  ;;  %v1204_v45 = vld [vmem:[%s2123_s30 + $0x30] sm:$0xff]  ;;  %v1206_v47 = vld [vmem:[%s2123_s30 + $0x40] sm:$0xff] }
 0x1b7   : > { %v1207_v46 = vld [vmem:[%s2123_s30 + $0x48] sm:$0xff]  ;;  %v1209_v48 = vld [vmem:[%s2123_s30 + $0x58] sm:$0xff]  ;;  %v1208_v49 = vld [vmem:[%s2123_s30 + $0x50] sm:$0xff] }
 0x1b8   : > { %v1211_v50 = vld [vmem:[%s2123_s30 + $0x68] sm:$0xff]  ;;  %v1210_v51 = vld [vmem:[%s2123_s30 + $0x60] sm:$0xff]  ;;  %v1213_v52 = vld [vmem:[%s2123_s30 + $0x78] sm:$0xff] }
 0x1b9   : > { %v1212_v53 = vld [vmem:[%s2123_s30 + $0x70] sm:$0xff]  ;;  %v1327_v54 = vld [vmem:[%s2128_s13 + $0x8] sm:$0xff]  ;;  %v1326_v55 = vld [vmem:[%s2128_s13] sm:$0xff] }
 0x1ba   : > { %1247 = vperm.xlu1 %1920, %v1201_v40   ;;  %1237 = vperm.xlu0 %1919, %v1199_v41   ;;  %v1329_v56 = vld [vmem:[%s2128_s13 + $0x18] sm:$0xff]  ;;  %v1328_v57 = vld [vmem:[%s2128_s13 + $0x10] sm:$0xff]  ;;  %v1331_v43 = vld [vmem:[%s2128_s13 + $0x28] sm:$0xff] }
 0x1bb   : > { %v1330_v58 = vld [vmem:[%s2128_s13 + $0x20] sm:$0xff]  ;;  %v1333_v60 = vld [vmem:[%s2128_s13 + $0x38] sm:$0xff]  ;;  %v1332_v61 = vld [vmem:[%s2128_s13 + $0x30] sm:$0xff] }
 0x1bc   : > { %v1335_v62 = vld [vmem:[%s2128_s13 + $0x48] sm:$0xff]  ;;  %v1334_v4 = vld [vmem:[%s2128_s13 + $0x40] sm:$0xff]  ;;  %v1337_v63 = vld [vmem:[%s2128_s13 + $0x58] sm:$0xff] }
 0x1bd   : > { %v1336_v0 = vld [vmem:[%s2128_s13 + $0x50] sm:$0xff]  ;;  %v1339_v1 = vld [vmem:[%s2128_s13 + $0x68] sm:$0xff]  ;;  %v1338_v59 = vld [vmem:[%s2128_s13 + $0x60] sm:$0xff] }
 0x1be   : > { %1257 = vperm.xlu1 %1920, %v1203_v30   ;;  %1252 = vperm.xlu0 %1919, %v1202_v42   ;;  %v1341_v2 = vld [vmem:[%s2128_s13 + $0x78] sm:$0xff]  ;;  %v1340_v3 = vld [vmem:[%s2128_s13 + $0x70] sm:$0xff]  ;;  %v1214_v22 = vld [vmem:[#allocation2 + $0x30] sm:$0xff] }
 0x1bf   : > { %v1215_v23 = vld [vmem:[#allocation2] sm:$0xff]  ;;  %v1343_v24 = vld [vmem:[#allocation3 + $0x68] sm:$0xff]  ;;  %v1216_v27 = vld [vmem:[#allocation2 + $0x58] sm:$0xff] }
 0x1c0   : > { %v1342_v25 = vld [vmem:[#allocation3 + $0x28] sm:$0xff]  ;;  %v1217_v29 = vld [vmem:[#allocation2 + $0x18] sm:$0xff]  ;;  %v1470_v35 = vld [vmem:[%s2133_s21] sm:$0xff] }
 0x1c1   : > { %v1471_v32 = vld [vmem:[%s2133_s21 + $0x8] sm:$0xff]  ;;  %v1345_v36 = vld [vmem:[#allocation3 + $0x40] sm:$0xff]  ;;  %v1344_v37 = vld [vmem:[#allocation3 + $0x10] sm:$0xff] }
 0x1c2   : > { %1267 = vperm.xlu1 %1920, %v1205_v44   ;;  %1262 = vperm.xlu0 %1919, %v1204_v45   ;;  %v1219_v44 = vld [vmem:[#allocation2 + $0x68] sm:$0xff]  ;;  %v1218_v45 = vld [vmem:[#allocation2 + $0x50] sm:$0xff] }
 0x1c6   : > { %1277 = vperm.xlu1 %1920, %v1207_v46   ;;  %1272 = vperm.xlu0 %1919, %v1206_v47  }
 0x1ca   : > { %1287 = vperm.xlu1 %1920, %v1209_v48   ;;  %1282 = vperm.xlu0 %1919, %v1208_v49   ;;  %v1473_v48 = vld [vmem:[%s2133_s21 + $0x18] sm:$0xff] }
 0x1ce   : > { %1297 = vperm.xlu1 %1920, %v1211_v50   ;;  %1292 = vperm.xlu0 %1919, %v1210_v51   ;;  %v1472_v51 = vld [vmem:[%s2133_s21 + $0x10] sm:$0xff] }
 0x1d2   : > { %1307 = vperm.xlu1 %1920, %v1213_v52   ;;  %1302 = vperm.xlu0 %1919, %v1212_v53   ;;  %v1347_v52 = vld [vmem:[#allocation3 + $0x30] sm:$0xff]  ;;  %v1346_v53 = vld [vmem:[#allocation3 + $0x48] sm:$0xff] }
 0x1d6   : > { %1365 = vperm.xlu1 %1920, %v1327_v54   ;;  %1360 = vperm.xlu0 %1919, %v1326_v55  }
 0x1da   : > { %1375 = vperm.xlu1 %1920, %v1329_v56   ;;  %1370 = vperm.xlu0 %1919, %v1328_v57  }
 0x1de   : > { %1385 = vperm.xlu1 %1920, %v1331_v43   ;;  %1380 = vperm.xlu0 %1919, %v1330_v58  }
 0x1e2   : > { %1395 = vperm.xlu1 %1920, %v1333_v60   ;;  %1390 = vperm.xlu0 %1919, %v1332_v61   ;;  %v1221_v60 = vld [vmem:[#allocation2 + $0x48] sm:$0xff] }
 0x1e3   : > { %v1220_v61 = vld [vmem:[#allocation2 + $0x8] sm:$0xff] }
 0x1e6   : > { %1405 = vperm.xlu1 %1920, %v1335_v62   ;;  %1400 = vperm.xlu0 %1919, %v1334_v4  }
 0x1ea   : > { %1415 = vperm.xlu1 %1920, %v1337_v63   ;;  %1410 = vperm.xlu0 %1919, %v1336_v0   ;;  %v1475_v63 = vld [vmem:[%s2133_s21 + $0x28] sm:$0xff] }
 0x1ee   : > { %1425 = vperm.xlu1 %1920, %v1339_v1   ;;  %1420 = vperm.xlu0 %1919, %v1338_v59   ;;  %v1474_v59 = vld [vmem:[%s2133_s21 + $0x20] sm:$0xff] }
 0x1f2   : > { %1435 = vperm.xlu1 %1920, %v1341_v2   ;;  %1430 = vperm.xlu0 %1919, %v1340_v3   ;;  %v1349_v2 = vld [vmem:[#allocation3 + $0x38] sm:$0xff]  ;;  %v1348_v3 = vld [vmem:[#allocation3 + $0x70] sm:$0xff] }
 0x231   : > { %v1243_v5 = vpop.permute.xlu1 %1242  ;;  %v1233_v6 = vpop.permute.xlu0 %1232 }
 0x232   : > { %v1310_v28 = vmul.f32 %v1233_v6, %v1214_v22  ;;  %v1312_v40 = vmul.f32 %v1243_v5, %v1216_v27  ;;  %v1223_v22 = vld [vmem:[#allocation2 + $0x20] sm:$0xff] }
 0x235   : > { %v1248_v7 = vpop.permute.xlu1 %1247  ;;  %v1238_v8 = vpop.permute.xlu0 %1237 }
 0x236   : > { %v1311_v31 = vmul.f32 %v1238_v8, %v1215_v23  ;;  %v1313_v41 = vmul.f32 %v1248_v7, %v1217_v29  ;;  %v1222_v23 = vld [vmem:[#allocation2 + $0x40] sm:$0xff]  ;;  %v1351_v29 = vld [vmem:[#allocation3 + $0x78] sm:$0xff] }
 0x239   : > { %v1258_v9 = vpop.permute.xlu1 %1257  ;;  %v1253_v10 = vpop.permute.xlu0 %1252 }
 0x23a   : > { %v1315_v56 = vmul.f32 %v1258_v9, %v1219_v44  ;;  %v1314_v57 = vmul.f32 %v1253_v10, %v1218_v45  ;;  %v1353_v44 = vld [vmem:[#allocation3 + $0x58] sm:$0xff] }
 0x23b   : > { %v1352_v45 = vld [vmem:[#allocation3 + $0x18] sm:$0xff] }
 0x23d   : > { %v2309_v11 = vpop.permute.xlu1 %1267  ;;  %v2311_v13 = vpop.permute.xlu0 %1262 }
 0x23e   : > { %v1317_v7 = vmul.f32 %v2309_v11, %v1221_v60  ;;  %v1316_v8 = vmul.f32 %v2311_v13, %v1220_v61 }
 0x241   : > { %v2313_v14 = vpop.permute.xlu1 %1277  ;;  %v2315_v12 = vpop.permute.xlu0 %1272 }
 0x242   : > { %v1319_v13 = vmul.f32 %v2313_v14, %v1223_v22 }
 0x245   : > { %v2317_v15 = vpop.permute.xlu1 %1287  ;;  %v2319_v16 = vpop.permute.xlu0 %1282 }
 0x249   : > { %v2321_v17 = vpop.permute.xlu1 %1297  ;;  %v2323_v18 = vpop.permute.xlu0 %1292 }
 0x24d   : > { %v2325_v20 = vpop.permute.xlu1 %1307  ;;  %v2327_v21 = vpop.permute.xlu0 %1302 }
 0x251   : > { %v1366_v19 = vpop.permute.xlu1 %1365  ;;  %v1361_v26 = vpop.permute.xlu0 %1360 }
 0x252   : > { %v1439_v33 = vmul.f32 %v1366_v19, %v1343_v24  ;;  %v1438_v34 = vmul.f32 %v1361_v26, %v1342_v25  ;;  %v1477_v19 = vld [vmem:[%s2133_s21 + $0x38] sm:$0xff] }
 0x254   : > { %v1455_v38 = vadd.f32 %v1439_v33, %v1311_v31  ;;  %v1454_v39 = vadd.f32 %v1438_v34, %v1310_v28  ;;  %v1476_v28 = vld [vmem:[%s2133_s21 + $0x30] sm:$0xff]  ;;  %v1318_v33 = vmul.f32 %v2315_v12, %v1222_v23 }
 0x255   : > { %v1376_v30 = vpop.permute.xlu1 %1375  ;;  %v1371_v42 = vpop.permute.xlu0 %1370  ;;  %v1350_v31 = vld [vmem:[#allocation3 + $0x20] sm:$0xff] }
 0x256   : > { %v1487_v46 = vadd.f32 %v1471_v32, %v1455_v38  ;;  %v1486_v47 = vadd.f32 %v1470_v35, %v1454_v39  ;;  %v1441_v49 = vmul.f32 %v1376_v30, %v1345_v36  ;;  %v1440_v50 = vmul.f32 %v1371_v42, %v1344_v37  ;;  %v1225_v36 = vld [vmem:[#allocation2 + $0x38] sm:$0xff]  ;;  %v1224_v37 = vld [vmem:[#allocation2 + $0x10] sm:$0xff] }
 0x257   : > { %v1478_v42 = vld [vmem:[%s2133_s21 + $0x40] sm:$0xff]  ;;  %v1321_v12 = vmul.f32 %v2317_v15, %v1225_v36 }
 0x258   : > { %1503 = vst [vmem:[%s2138_s24 + $0x8] sm:$0xff] %v1487_v46  ;;  %1502 = vst [vmem:[%s2138_s24] sm:$0xff] %v1486_v47  ;;  %v1457_v54 = vadd.f32 %v1441_v49, %v1313_v41  ;;  %v1456_v55 = vadd.f32 %v1440_v50, %v1312_v40  ;;  %v1479_v40 = vld [vmem:[%s2133_s21 + $0x48] sm:$0xff]  ;;  %v1320_v47 = vmul.f32 %v2319_v16, %v1224_v37  ;;  %v1227_v50 = vld [vmem:[#allocation2 + $0x70] sm:$0xff] }
 0x259   : > { %v1386_v43 = vpop.permute.xlu1 %1385  ;;  %v1381_v58 = vpop.permute.xlu0 %1380  ;;  %v1323_v16 = vmul.f32 %v2321_v17, %v1227_v50 }
 0x25a   : > { %v1489_v62 = vadd.f32 %v1473_v48, %v1457_v54  ;;  %v1488_v4 = vadd.f32 %v1472_v51, %v1456_v55  ;;  %v1443_v0 = vmul.f32 %v1386_v43, %v1347_v52  ;;  %v1442_v1 = vmul.f32 %v1381_v58, %v1346_v53  ;;  %v1226_v51 = vld [vmem:[#allocation2 + $0x60] sm:$0xff]  ;;  %v1481_v54 = vld [vmem:[%s2133_s21 + $0x58] sm:$0xff] }
 0x25b   : > { %v1355_v43 = vld [vmem:[#allocation3 + $0x8] sm:$0xff]  ;;  %v1354_v58 = vld [vmem:[#allocation3] sm:$0xff]  ;;  %v1322_v61 = vmul.f32 %v2323_v18, %v1226_v51 }
 0x25c   : > { %1505 = vst [vmem:[%s2138_s24 + $0x18] sm:$0xff] %v1489_v62  ;;  %1504 = vst [vmem:[%s2138_s24 + $0x10] sm:$0xff] %v1488_v4  ;;  %v1459_v5 = vadd.f32 %v1443_v0, %v1315_v56  ;;  %v1458_v6 = vadd.f32 %v1442_v1, %v1314_v57  ;;  %v1480_v57 = vld [vmem:[%s2133_s21 + $0x50] sm:$0xff]  ;;  %v1228_v0 = vld [vmem:[#allocation2 + $0x78] sm:$0xff] }
 0x25d   : > { %v1396_v9 = vpop.permute.xlu1 %1395  ;;  %v1391_v10 = vpop.permute.xlu0 %1390 }
 0x25e   : > { %v1491_v24 = vadd.f32 %v1475_v63, %v1459_v5  ;;  %v1490_v25 = vadd.f32 %v1474_v59, %v1458_v6  ;;  %v1445_v26 = vmul.f32 %v1396_v9, %v1349_v2  ;;  %v1444_v27 = vmul.f32 %v1391_v10, %v1348_v3  ;;  %v1229_v63 = vld [vmem:[#allocation2 + $0x28] sm:$0xff]  ;;  %v1483_v2 = vld [vmem:[%s2133_s21 + $0x68] sm:$0xff]  ;;  %v1482_v6 = vld [vmem:[%s2133_s21 + $0x60] sm:$0xff] }
 0x25f   : > { %v1325_v9 = vmul.f32 %v2325_v20, %v1229_v63  ;;  %v1324_v10 = vmul.f32 %v2327_v21, %v1228_v0 }
 0x260   : > { %1507 = vst [vmem:[%s2138_s24 + $0x28] sm:$0xff] %v1491_v24  ;;  %1506 = vst [vmem:[%s2138_s24 + $0x20] sm:$0xff] %v1490_v25  ;;  %v1461_v32 = vadd.f32 %v1445_v26, %v1317_v7  ;;  %v1460_v11 = vadd.f32 %v1444_v27, %v1316_v8  ;;  %v1357_v7 = vld [vmem:[#allocation3 + $0x50] sm:$0xff]  ;;  %v1356_v8 = vld [vmem:[#allocation3 + $0x60] sm:$0xff] }
 0x261   : > { %v1406_v34 = vpop.permute.xlu1 %1405  ;;  %v1401_v35 = vpop.permute.xlu0 %1400  ;;  %v1485_v27 = vld [vmem:[%s2133_s21 + $0x78] sm:$0xff] }
 0x262   : > { %v1493_v38 = vadd.f32 %v1477_v19, %v1461_v32  ;;  %v1492_v39 = vadd.f32 %v1476_v28, %v1460_v11  ;;  %v1447_v41 = vmul.f32 %v1406_v34, %v1351_v29  ;;  %v1446_v30 = vmul.f32 %v1401_v35, %v1350_v31  ;;  %v1484_v28 = vld [vmem:[%s2133_s21 + $0x70] sm:$0xff] }
 0x264   : > { %1509 = vst [vmem:[%s2138_s24 + $0x38] sm:$0xff] %v1493_v38  ;;  %1508 = vst [vmem:[%s2138_s24 + $0x30] sm:$0xff] %v1492_v39  ;;  %v1463_v46 = vadd.f32 %v1447_v41, %v1319_v13  ;;  %v1462_v14 = vadd.f32 %v1446_v30, %v1318_v33 }
 0x265   : > { %v1416_v48 = vpop.permute.xlu1 %1415  ;;  %v1411_v49 = vpop.permute.xlu0 %1410 }
 0x266   : > { %v1495_v52 = vadd.f32 %v1479_v40, %v1463_v46  ;;  %v1494_v53 = vadd.f32 %v1478_v42, %v1462_v14  ;;  %v1449_v55 = vmul.f32 %v1416_v48, %v1353_v44  ;;  %v1448_v56 = vmul.f32 %v1411_v49, %v1352_v45 }
 0x268   : > { %1511 = vst [vmem:[%s2138_s24 + $0x48] sm:$0xff] %v1495_v52  ;;  %1510 = vst [vmem:[%s2138_s24 + $0x40] sm:$0xff] %v1494_v53  ;;  %v1465_v60 = vadd.f32 %v1449_v55, %v1321_v12  ;;  %v1464_v15 = vadd.f32 %v1448_v56, %v1320_v47 }
 0x269   : > { %v1426_v62 = vpop.permute.xlu1 %1425  ;;  %v1421_v4 = vpop.permute.xlu0 %1420 }
 0x26a   : > { %v1497_v1 = vadd.f32 %v1481_v54, %v1465_v60  ;;  %v1496_v59 = vadd.f32 %v1480_v57, %v1464_v15  ;;  %v1451_v3 = vmul.f32 %v1426_v62, %v1355_v43  ;;  %v1450_v5 = vmul.f32 %v1421_v4, %v1354_v58 }
 0x26c   : > { %1513 = vst [vmem:[%s2138_s24 + $0x58] sm:$0xff] %v1497_v1  ;;  %1512 = vst [vmem:[%s2138_s24 + $0x50] sm:$0xff] %v1496_v59  ;;  %v1467_v17 = vadd.f32 %v1451_v3, %v1323_v16  ;;  %v1466_v18 = vadd.f32 %v1450_v5, %v1322_v61 }
 0x26d   : > { %v1436_v22 = vpop.permute.xlu1 %1435  ;;  %v1431_v23 = vpop.permute.xlu0 %1430 }
 0x26e   : > { %v1499_v24 = vadd.f32 %v1483_v2, %v1467_v17  ;;  %v1498_v25 = vadd.f32 %v1482_v6, %v1466_v18  ;;  %v1453_v19 = vmul.f32 %v1436_v22, %v1357_v7  ;;  %v1452_v26 = vmul.f32 %v1431_v23, %v1356_v8 }
 0x270   : > { %1515 = vst [vmem:[%s2138_s24 + $0x68] sm:$0xff] %v1499_v24  ;;  %1514 = vst [vmem:[%s2138_s24 + $0x60] sm:$0xff] %v1498_v25  ;;  %v1469_v29 = vadd.f32 %v1453_v19, %v1325_v9  ;;  %v1468_v31 = vadd.f32 %v1452_v26, %v1324_v10 }
 0x272   : > { %v1501_v32 = vadd.f32 %v1485_v27, %v1469_v29  ;;  %v1500_v11 = vadd.f32 %v1484_v28, %v1468_v31 }
 0x274   : > { %1517 = vst [vmem:[%s2138_s24 + $0x78] sm:$0xff] %v1501_v32  ;;  %1516 = vst [vmem:[%s2138_s24 + $0x70] sm:$0xff] %v1500_v11 }
 0x275 PF: > { %s18_s11 = sadd.s32 1, %s1975_s11   ;;  %s2409_s13 = sld [smem:[#allocation5_spill]] }
 0x276   : > { %p15_p0 = scmp.ge.s32.totalorder %s18_s11, 6   ;;  %s2410_s19 = sld [smem:[#allocation6_spill]] }
 0x277   : > { %s2411_s27 = smov %s1955_s28  ;;  %s2412_s28 = smov %s2076_s18 }
 0x278   : > { %s2413_s29 = smov %s1967_s9  ;;  %s2414_s30 = smov %s1971_s10 }
 0x279   :  { %17 = sbr.rel (!%p15_p0) target bundleno = 7 (0x7), region = 150 }
 0x27b   : > { %s2415_s9 = smov %s2409_s13 }
 0x27c   : > { %s2416_s10 = smov %s2410_s19 }

</bundles_post_ra>
